<compile_context>
chip_gen: v7x
topology: tpu7x:2x2x1
jax: 0.10.0
libtpu: 0.0.40
codegen_flags: <defaults>
</compile_context>

<pallas_src>
import math
from functools import partial

import jax
import jax.numpy as jnp
from jax.experimental import pallas as pl
from jax.experimental.pallas import tpu as pltpu

_EPS = 1e-5
_VMEM_LIMIT = 32 * 1024 * 1024    # explicit scoped-VMEM cap (v7x: 64 MiB physical)
_VMEM_BUDGET = 20 * 1024 * 1024   # target per-step footprint incl. double buffers


# ----------------------------- kernel helpers --------------------------------

def _fc1_t(xt_ref, w1_ref, b1_ref):
    """h1^T = W1 @ x^T + b1  ->  (H, TB), f32 accumulation."""
    w1 = w1_ref[...]
    xt = xt_ref[...].astype(w1.dtype)           # cast only at the MXU input
    return jnp.dot(w1, xt, preferred_element_type=jnp.float32) + b1_ref[...]


def _bn_scale_shift(mean, var, gamma, beta):
    """Folded BN affine: one FMA over the (H, TB) slab instead of three passes."""
    scale = gamma * jax.lax.rsqrt(jnp.maximum(var, 0.0) + _EPS)
    return scale, beta - mean * scale


def _tail_t(h1t, at_ref, w2s_ref, w2a_ref, b2_ref, w3_ref, b3_ref,
            w4_ref, b4_ref):
    """fc2 -> relu -> fc3 -> relu -> fc4 on transposed activations.

    Returns a lane-dense (1, TB) row (fc4 done on the VPU: multiply by the
    (H, 1) fc4 column + sublane reduce -- no width-1 MXU matmul, no relayout).
    """
    w2s = w2s_ref[...]
    w2a = w2a_ref[...]
    at = at_ref[...].astype(w2a.dtype)
    h2t = jnp.maximum(
        jnp.dot(w2s, h1t.astype(w2s.dtype), preferred_element_type=jnp.float32)
        + jnp.dot(w2a, at, preferred_element_type=jnp.float32)
        + b2_ref[...], 0.0)
    w3 = w3_ref[...]
    h3t = jnp.maximum(
        jnp.dot(w3, h2t.astype(w3.dtype), preferred_element_type=jnp.float32)
        + b3_ref[...], 0.0)
    return jnp.sum(h3t * w4_ref[...], axis=0, keepdims=True) + b4_ref[...]


# ----------------------------- kernels ----------------------------------------

def _fused_single_kernel(xt_ref, at_ref,
                         w1_ref, b1_ref, gamma_ref, beta_ref,
                         w2s_ref, w2a_ref, b2_ref, w3_ref, b3_ref,
                         w4_ref, b4_ref, out_ref):
    """Whole batch in one tile: fc1 + BN(batch stats) + relu + fc2..fc4."""
    h1t = _fc1_t(xt_ref, w1_ref, b1_ref)                      # (H, B) f32
    inv_n = 1.0 / xt_ref.shape[-1]                            # no padding here
    mean = jnp.sum(h1t, axis=1, keepdims=True) * inv_n        # (H, 1)
    var = jnp.sum(h1t * h1t, axis=1, keepdims=True) * inv_n - mean * mean
    scale, shift = _bn_scale_shift(mean, var, gamma_ref[...], beta_ref[...])
    h1t = jnp.maximum(h1t * scale + shift, 0.0)
    out_ref[...] = _tail_t(h1t, at_ref, w2s_ref, w2a_ref, b2_ref,
                           w3_ref, b3_ref, w4_ref, b4_ref)


def _fused_grid_kernel(xt_ref, at_ref,
                       w1_ref, b1_ref, gamma_ref, beta_ref,
                       w2s_ref, w2a_ref, b2_ref, w3_ref, b3_ref,
                       w4_ref, b4_ref, out_ref,
                       sum_ref, sumsq_ref, scale_ref, shift_ref,
                       *, n_valid, tile_b):
    """Single launch, grid=(2, n_tiles).

    phase 0: accumulate full-batch sum / sum-of-squares of fc1 into VMEM
             scratch; on the last tile finalize the folded BN scale/shift.
    phase 1: recompute fc1 per tile, normalize with the global stats, run the
             fc2/fc3/fc4 tail and store a lane-dense (1, TB) row.
    """
    phase = pl.program_id(0)
    i = pl.program_id(1)
    n_tiles = pl.num_programs(1)

    @pl.when(phase == 0)
    def _stats_phase():
        @pl.when(i == 0)
        def _():
            sum_ref[...] = jnp.zeros_like(sum_ref)
            sumsq_ref[...] = jnp.zeros_like(sumsq_ref)

        h1t = _fc1_t(xt_ref, w1_ref, b1_ref)                  # (H, TB)
        col = i * tile_b + jax.lax.broadcasted_iota(jnp.int32, (1, tile_b), 1)
        h1v = jnp.where(col < n_valid, h1t, 0.0)              # mask lane padding
        sum_ref[...] += jnp.sum(h1v, axis=1, keepdims=True)
        sumsq_ref[...] += jnp.sum(h1v * h1v, axis=1, keepdims=True)

        @pl.when(i == n_tiles - 1)
        def _():
            inv_n = 1.0 / float(n_valid)
            mean = sum_ref[...] * inv_n
            var = sumsq_ref[...] * inv_n - mean * mean
            scale, shift = _bn_scale_shift(mean, var, gamma_ref[...],
                                           beta_ref[...])
            scale_ref[...] = scale
            shift_ref[...] = shift

    @pl.when(phase == 1)
    def _mlp_phase():
        h1t = _fc1_t(xt_ref, w1_ref, b1_ref)
        h1t = jnp.maximum(h1t * scale_ref[...] + shift_ref[...], 0.0)
        out_ref[...] = _tail_t(h1t, at_ref, w2s_ref, w2a_ref, b2_ref,
                               w3_ref, b3_ref, w4_ref, b4_ref)


def _stats_mc_kernel(xt_ref, w1_ref, b1_ref, sum_ref, sumsq_ref,
                     *, n_valid, tile_b, tiles_per_core):
    """Multicore pass 1: per-core partial sum / sum-sq of fc1 over the batch."""
    c = pl.program_id(0)        # core id ("parallel" -> sharded across TCs)
    t = pl.program_id(1)        # tile within this core

    @pl.when(t == 0)
    def _():
        sum_ref[...] = jnp.zeros_like(sum_ref)
        sumsq_ref[...] = jnp.zeros_like(sumsq_ref)

    h1t = _fc1_t(xt_ref, w1_ref, b1_ref)
    col = ((c * tiles_per_core + t) * tile_b
           + jax.lax.broadcasted_iota(jnp.int32, (1, tile_b), 1))
    h1v = jnp.where(col < n_valid, h1t, 0.0)
    sum_ref[...] += jnp.sum(h1v, axis=1, keepdims=True)[None]
    sumsq_ref[...] += jnp.sum(h1v * h1v, axis=1, keepdims=True)[None]


def _main_mc_kernel(xt_ref, at_ref, scale_ref, shift_ref,
                    w1_ref, b1_ref, w2s_ref, w2a_ref, b2_ref,
                    w3_ref, b3_ref, w4_ref, b4_ref, out_ref):
    """Multicore pass 2: BN scale/shift precomputed in the wrapper."""
    h1t = _fc1_t(xt_ref, w1_ref, b1_ref)
    h1t = jnp.maximum(h1t * scale_ref[...] + shift_ref[...], 0.0)
    out_ref[...] = _tail_t(h1t, at_ref, w2s_ref, w2a_ref, b2_ref,
                           w3_ref, b3_ref, w4_ref, b4_ref)


# ----------------------------- wrapper ----------------------------------------

def _resident(arr):
    """Weight/constant spec: same block every grid step -> stays VMEM-resident."""
    zero = (0,) * arr.ndim
    return pl.BlockSpec(arr.shape, lambda *_: zero)


def critic_forward(state, actions, params, *, tile_batch=1024, multicore=False):
    """Forward pass of CriticNetwork (training-mode BatchNorm batch stats).

    tile_batch: batch-lane tile (rounded to a multiple of 128 on the grid path).
    multicore=True selects the two-call path whose grids are 'parallel' so the
    work shards across v7x's two TensorCores (no-op on v5e/v6e).
    """
    B, S = state.shape
    A = actions.shape[1]
    H = params["w1"].shape[0]

    weight_args = (params["w1"], params["b1"], params["gamma"], params["beta"],
                   params["w2s"], params["w2a"], params["b2"],
                   params["w3"], params["b3"], params["w4col"], params["b4"])

    # Lane-dense orientation: batch on lanes, features on sublanes.
    xt = state.T                                  # (S, B)
    at = actions.T                                # (A, B)

    # ---------------- small batch: one fused call, everything VMEM-resident ---
    if B <= max(int(tile_batch), 8):
        vmem = pl.BlockSpec(memory_space=pltpu.MemorySpace.VMEM)
        out = pl.pallas_call(
            _fused_single_kernel,
            out_shape=jax.ShapeDtypeStruct((1, B), jnp.float32),
            in_specs=[vmem] * (2 + len(weight_args)),
            out_specs=vmem,
        )(xt, at, *weight_args)
        return out.reshape(B, 1)

    # ---------------- large batch: batch-lane grid -----------------------------
    tb = max(128, (min(int(tile_batch), B) // 128) * 128)

    def _est(t):  # rough per-step VMEM footprint (activations + dbl-buffered IO)
        acts = 4 * t * H * 4
        io = 2 * 2 * (t * (S + A) * 4 + t * 4)
        wts = 2 * sum(w.size * w.dtype.itemsize for w in weight_args)
        return acts + io + wts + (2 << 20)

    while tb > 128 and _est(tb) > _VMEM_BUDGET:
        tb -= 128

    n_tiles = -(-B // tb)
    tiles_per_core = -(-n_tiles // 2)
    if multicore:
        n_tiles = 2 * tiles_per_core      # even tile count load-balances 2 TCs
    b_pad = n_tiles * tb
    if b_pad != B:
        # TODO(synk): handle the ragged last tile in-kernel instead of padding.
        xt = jnp.pad(xt, ((0, 0), (0, b_pad - B)))
        at = jnp.pad(at, ((0, 0), (0, b_pad - B)))

    if not multicore:
        # Fused two-phase kernel: phase 0 = stats, phase 1 = MLP (one launch).
        out = pl.pallas_call(
            partial(_fused_grid_kernel, n_valid=B, tile_b=tb),
            out_shape=jax.ShapeDtypeStruct((1, b_pad), jnp.float32),
            grid=(2, n_tiles),
            in_specs=[pl.BlockSpec((S, tb), lambda p, i: (0, i)),
                      # actions / output only move during phase 1 (i * p)
                      pl.BlockSpec((A, tb), lambda p, i: (0, i * p))]
                     + [_resident(w) for w in weight_args],
            out_specs=pl.BlockSpec((1, tb), lambda p, i: (0, i * p)),
            scratch_shapes=[pltpu.VMEM((H, 1), jnp.float32)] * 4,
            compiler_params=pltpu.CompilerParams(
                dimension_semantics=("arbitrary", "arbitrary"),
                vmem_limit_bytes=_VMEM_LIMIT),
        )(xt, at, *weight_args)
        return out[:, :B].reshape(B, 1)

    # ----- multicore (v7x) path: stats sharded across cores, parallel MLP -----
    sums, sumsqs = pl.pallas_call(
        partial(_stats_mc_kernel, n_valid=B, tile_b=tb,
                tiles_per_core=tiles_per_core),
        out_shape=(jax.ShapeDtypeStruct((2, H, 1), jnp.float32),
                   jax.ShapeDtypeStruct((2, H, 1), jnp.float32)),
        grid=(2, tiles_per_core),
        in_specs=[pl.BlockSpec((S, tb), lambda c, t: (0, c * tiles_per_core + t)),
                  _resident(params["w1"]), _resident(params["b1"])],
        out_specs=(pl.BlockSpec((1, H, 1), lambda c, t: (c, 0, 0)),
                   pl.BlockSpec((1, H, 1), lambda c, t: (c, 0, 0))),
        compiler_params=pltpu.CompilerParams(
            dimension_semantics=("parallel", "arbitrary"),
            vmem_limit_bytes=_VMEM_LIMIT),
    )(xt, params["w1"], params["b1"])

    # Finalize folded BN scale/shift once (hoisted out of the per-tile body).
    inv_n = 1.0 / B
    mean = jnp.sum(sums, axis=0) * inv_n                          # (H, 1)
    var = jnp.maximum(jnp.sum(sumsqs, axis=0) * inv_n - mean * mean, 0.0)
    scale = params["gamma"] * jax.lax.rsqrt(var + _EPS)
    shift = params["beta"] - mean * scale

    out = pl.pallas_call(
        _main_mc_kernel,
        out_shape=jax.ShapeDtypeStruct((1, b_pad), jnp.float32),
        grid=(n_tiles,),
        in_specs=[pl.BlockSpec((S, tb), lambda i: (0, i)),
                  pl.BlockSpec((A, tb), lambda i: (0, i)),
                  _resident(scale), _resident(shift),
                  _resident(params["w1"]), _resident(params["b1"]),
                  _resident(params["w2s"]), _resident(params["w2a"]),
                  _resident(params["b2"]), _resident(params["w3"]),
                  _resident(params["b3"]), _resident(params["w4col"]),
                  _resident(params["b4"])],
        out_specs=pl.BlockSpec((1, tb), lambda i: (0, i)),
        compiler_params=pltpu.CompilerParams(
            dimension_semantics=("parallel",),
            vmem_limit_bytes=_VMEM_LIMIT),
    )(xt, at, scale, shift, params["w1"], params["b1"], params["w2s"],
      params["w2a"], params["b2"], params["w3"], params["b3"],
      params["w4col"], params["b4"])
    return out[:, :B].reshape(B, 1)


# ----------------------------- params & reference -----------------------------

def init_params(key, state_size, action_size, hidden, matmul_dtype=jnp.bfloat16):
    """Init mirroring CriticNetwork.reset_params (same uniform ranges).

    Weights are stored in PyTorch orientation (out_features, in_features),
    fc4 as an (H, 1) column, biases/BN as (H, 1) columns.  MXU-facing weights
    are stored once in `matmul_dtype` (bf16 by default on v5e/v6e/v7x)."""
    ks = jax.random.split(key, 8)

    def u(k, shape, lim):
        return jax.random.uniform(k, shape, jnp.float32, -lim, lim)

    lim_h = 1.0 / math.sqrt(hidden)       # hidden_init uses weight.size()[0]
    w2_full = u(ks[2], (hidden, hidden + action_size), lim_h)

    p = {
        "w1": u(ks[0], (hidden, state_size), lim_h),
        "b1": u(ks[1], (hidden, 1), 1.0 / math.sqrt(state_size)),
        "gamma": jnp.ones((hidden, 1), jnp.float32),
        "beta": jnp.zeros((hidden, 1), jnp.float32),
        "w2s": w2_full[:, :hidden],
        "w2a": w2_full[:, hidden:],
        "b2": u(ks[3], (hidden, 1), 1.0 / math.sqrt(hidden + action_size)),
        "w3": u(ks[4], (hidden, hidden), lim_h),
        "b3": u(ks[5], (hidden, 1), 1.0 / math.sqrt(hidden)),
        "w4col": u(ks[6], (hidden, 1), 0.003),
        "b4": u(ks[7], (1, 1), 1.0 / math.sqrt(hidden)),
    }
    for k in ("w1", "w2s", "w2a", "w3"):
        p[k] = p[k].astype(matmul_dtype)
    return p


def reference_forward(state, actions, p):
    """Pure-JAX reference (f32 math, weights upcast to f32)."""
    f32 = lambda w: w.astype(jnp.float32)
    h1 = state @ f32(p["w1"]).T + p["b1"][:, 0]
    mean = jnp.mean(h1, axis=0, keepdims=True)
    var = jnp.mean((h1 - mean) ** 2, axis=0, keepdims=True)
    h1 = (h1 - mean) * jax.lax.rsqrt(var + _EPS) * p["gamma"][:, 0] + p["beta"][:, 0]
    h1 = jnp.maximum(h1, 0.0)
    h2 = jnp.maximum(h1 @ f32(p["w2s"]).T + actions @ f32(p["w2a"]).T
                     + p["b2"][:, 0], 0.0)
    h3 = jnp.maximum(h2 @ f32(p["w3"]).T + p["b3"][:, 0], 0.0)
    return h3 @ p["w4col"] + p["b4"][:, 0]


# ----------------------------- demo / test -------------------------------------

if __name__ == "__main__":
    STATE, ACTION, HIDDEN = 16, 4, 128

    key = jax.random.PRNGKey(0)
    k_s, k_a, k_p, k_s2, k_a2 = jax.random.split(key, 5)

    params_f32 = init_params(k_p, STATE, ACTION, HIDDEN, matmul_dtype=jnp.float32)
    params_bf16 = init_params(k_p, STATE, ACTION, HIDDEN)   # bf16 default

    # 1) small batch -> single fused kernel, f32 weights, tight check.
    B = 8
    state = jax.random.normal(k_s, (B, STATE), jnp.float32)
    actions = jax.random.normal(k_a, (B, ACTION), jnp.float32)
    ref = reference_forward(state, actions, params_f32)
    out = jax.block_until_ready(critic_forward(state, actions, params_f32))
    assert out.shape == (B, 1)
    assert jnp.allclose(out, ref, atol=5e-4, rtol=5e-4), "single-tile f32 mismatch"

    # 2) small batch with bf16 matmul weights (default storage).
    out_bf = jax.block_until_ready(critic_forward(state, actions, params_bf16))
    assert out_bf.shape == (B, 1)
    assert jnp.allclose(out_bf, ref, atol=5e-2, rtol=5e-2), "bf16 mismatch"

    # 3) larger batch -> fused two-phase grid path (stats phase + MLP phase).
    B2 = 300
    state2 = jax.random.normal(k_s2, (B2, STATE), jnp.float32)
    actions2 = jax.random.normal(k_a2, (B2, ACTION), jnp.float32)
    ref2 = reference_forward(state2, actions2, params_f32)
    out2 = jax.block_until_ready(
        critic_forward(state2, actions2, params_f32, tile_batch=128))
    assert out2.shape == (B2, 1)
    assert jnp.allclose(out2, ref2, atol=1e-3, rtol=1e-3), "fused grid mismatch"

    # 4) multicore (v7x-style) path: parallel stats + parallel MLP, even tiles.
    out3 = jax.block_until_ready(
        critic_forward(state2, actions2, params_f32, tile_batch=128,
                       multicore=True))
    assert out3.shape == (B2, 1)
    assert jnp.allclose(out3, ref2, atol=1e-3, rtol=1e-3), "multicore mismatch"

    print("KERNEL_OK")
</pallas_src>

<mosaic_0001>
module attributes {stable_mosaic.version = 11 : i64} {
  func.func @_fused_single_kernel(%arg0: memref<16x8xf32, #tpu.memory_space<vmem>>, %arg1: memref<4x8xf32, #tpu.memory_space<vmem>>, %arg2: memref<128x16xf32, #tpu.memory_space<vmem>>, %arg3: memref<128x1xf32, #tpu.memory_space<vmem>>, %arg4: memref<128x1xf32, #tpu.memory_space<vmem>>, %arg5: memref<128x1xf32, #tpu.memory_space<vmem>>, %arg6: memref<128x128xf32, #tpu.memory_space<vmem>>, %arg7: memref<128x4xf32, #tpu.memory_space<vmem>>, %arg8: memref<128x1xf32, #tpu.memory_space<vmem>>, %arg9: memref<128x128xf32, #tpu.memory_space<vmem>>, %arg10: memref<128x1xf32, #tpu.memory_space<vmem>>, %arg11: memref<128x1xf32, #tpu.memory_space<vmem>>, %arg12: memref<1x1xf32, #tpu.memory_space<vmem>>, %arg13: memref<1x8xf32, #tpu.memory_space<vmem>>) attributes {dimension_semantics = [], scalar_prefetch = 0 : i64, scratch_operands = 0 : i64, tpu.core_type = #tpu.core_type<tc>} {
    %c0 = arith.constant 0 : index
    %c0_0 = arith.constant 0 : index
    %0 = vector.load %arg2[%c0, %c0_0] : memref<128x16xf32, #tpu.memory_space<vmem>>, vector<128x16xf32>
    %c0_1 = arith.constant 0 : index
    %c0_2 = arith.constant 0 : index
    %1 = vector.load %arg0[%c0_1, %c0_2] : memref<16x8xf32, #tpu.memory_space<vmem>>, vector<16x8xf32>
    %cst = arith.constant dense<0.000000e+00> : vector<128x8xf32>
    %2 = tpu.matmul %0, %1, %cst {dimension_numbers = #tpu.dot_dimension_numbers<[1], [0], [0], [1], [0, 0, 1, 1], [], []>} : vector<128x16xf32>, vector<16x8xf32>, vector<128x8xf32> -> vector<128x8xf32>
    %c0_3 = arith.constant 0 : index
    %c0_4 = arith.constant 0 : index
    %3 = vector.load %arg3[%c0_3, %c0_4] : memref<128x1xf32, #tpu.memory_space<vmem>>, vector<128x1xf32>
    %4 = vector.broadcast %3 : vector<128x1xf32> to vector<128x8xf32>
    %5 = arith.addf %2, %4 : vector<128x8xf32>
    %cst_5 = arith.constant dense<0.000000e+00> : vector<128xf32>
    %6 = vector.multi_reduction <add>, %5, %cst_5 [1] : vector<128x8xf32> to vector<128xf32>
    %7 = vector.shape_cast %6 : vector<128xf32> to vector<128x1xf32>
    %cst_6 = arith.constant 1.250000e-01 : f32
    %8 = vector.broadcast %cst_6 : f32 to vector<128x1xf32>
    %9 = arith.mulf %7, %8 : vector<128x1xf32>
    %10 = arith.mulf %5, %5 : vector<128x8xf32>
    %cst_7 = arith.constant dense<0.000000e+00> : vector<128xf32>
    %11 = vector.multi_reduction <add>, %10, %cst_7 [1] : vector<128x8xf32> to vector<128xf32>
    %12 = vector.shape_cast %11 : vector<128xf32> to vector<128x1xf32>
    %cst_8 = arith.constant 1.250000e-01 : f32
    %13 = vector.broadcast %cst_8 : f32 to vector<128x1xf32>
    %14 = arith.mulf %12, %13 : vector<128x1xf32>
    %15 = arith.mulf %9, %9 : vector<128x1xf32>
    %16 = arith.subf %14, %15 : vector<128x1xf32>
    %c0_9 = arith.constant 0 : index
    %c0_10 = arith.constant 0 : index
    %17 = vector.load %arg4[%c0_9, %c0_10] : memref<128x1xf32, #tpu.memory_space<vmem>>, vector<128x1xf32>
    %c0_11 = arith.constant 0 : index
    %c0_12 = arith.constant 0 : index
    %18 = vector.load %arg5[%c0_11, %c0_12] : memref<128x1xf32, #tpu.memory_space<vmem>>, vector<128x1xf32>
    %cst_13 = arith.constant 0.000000e+00 : f32
    %19 = vector.broadcast %cst_13 : f32 to vector<128x1xf32>
    %20 = arith.maximumf %16, %19 : vector<128x1xf32>
    %cst_14 = arith.constant 9.99999974E-6 : f32
    %21 = vector.broadcast %cst_14 : f32 to vector<128x1xf32>
    %22 = arith.addf %20, %21 : vector<128x1xf32>
    %23 = math.rsqrt %22 : vector<128x1xf32>
    %24 = arith.mulf %17, %23 : vector<128x1xf32>
    %25 = arith.mulf %9, %24 : vector<128x1xf32>
    %26 = arith.subf %18, %25 : vector<128x1xf32>
    %27 = vector.broadcast %24 : vector<128x1xf32> to vector<128x8xf32>
    %28 = arith.mulf %5, %27 : vector<128x8xf32>
    %29 = vector.broadcast %26 : vector<128x1xf32> to vector<128x8xf32>
    %30 = arith.addf %28, %29 : vector<128x8xf32>
    %cst_15 = arith.constant 0.000000e+00 : f32
    %31 = vector.broadcast %cst_15 : f32 to vector<128x8xf32>
    %32 = arith.maximumf %30, %31 : vector<128x8xf32>
    %c0_16 = arith.constant 0 : index
    %c0_17 = arith.constant 0 : index
    %33 = vector.load %arg6[%c0_16, %c0_17] : memref<128x128xf32, #tpu.memory_space<vmem>>, vector<128x128xf32>
    %c0_18 = arith.constant 0 : index
    %c0_19 = arith.constant 0 : index
    %34 = vector.load %arg7[%c0_18, %c0_19] : memref<128x4xf32, #tpu.memory_space<vmem>>, vector<128x4xf32>
    %c0_20 = arith.constant 0 : index
    %c0_21 = arith.constant 0 : index
    %35 = vector.load %arg1[%c0_20, %c0_21] : memref<4x8xf32, #tpu.memory_space<vmem>>, vector<4x8xf32>
    %cst_22 = arith.constant dense<0.000000e+00> : vector<128x8xf32>
    %36 = tpu.matmul %33, %32, %cst_22 {dimension_numbers = #tpu.dot_dimension_numbers<[1], [0], [0], [1], [0, 0, 1, 1], [], []>} : vector<128x128xf32>, vector<128x8xf32>, vector<128x8xf32> -> vector<128x8xf32>
    %cst_23 = arith.constant dense<0.000000e+00> : vector<128x8xf32>
    %37 = tpu.matmul %34, %35, %cst_23 {dimension_numbers = #tpu.dot_dimension_numbers<[1], [0], [0], [1], [0, 0, 1, 1], [], []>} : vector<128x4xf32>, vector<4x8xf32>, vector<128x8xf32> -> vector<128x8xf32>
    %38 = arith.addf %36, %37 : vector<128x8xf32>
    %c0_24 = arith.constant 0 : index
    %c0_25 = arith.constant 0 : index
    %39 = vector.load %arg8[%c0_24, %c0_25] : memref<128x1xf32, #tpu.memory_space<vmem>>, vector<128x1xf32>
    %40 = vector.broadcast %39 : vector<128x1xf32> to vector<128x8xf32>
    %41 = arith.addf %38, %40 : vector<128x8xf32>
    %cst_26 = arith.constant 0.000000e+00 : f32
    %42 = vector.broadcast %cst_26 : f32 to vector<128x8xf32>
    %43 = arith.maximumf %41, %42 : vector<128x8xf32>
    %c0_27 = arith.constant 0 : index
    %c0_28 = arith.constant 0 : index
    %44 = vector.load %arg9[%c0_27, %c0_28] : memref<128x128xf32, #tpu.memory_space<vmem>>, vector<128x128xf32>
    %cst_29 = arith.constant dense<0.000000e+00> : vector<128x8xf32>
    %45 = tpu.matmul %44, %43, %cst_29 {dimension_numbers = #tpu.dot_dimension_numbers<[1], [0], [0], [1], [0, 0, 1, 1], [], []>} : vector<128x128xf32>, vector<128x8xf32>, vector<128x8xf32> -> vector<128x8xf32>
    %c0_30 = arith.constant 0 : index
    %c0_31 = arith.constant 0 : index
    %46 = vector.load %arg10[%c0_30, %c0_31] : memref<128x1xf32, #tpu.memory_space<vmem>>, vector<128x1xf32>
    %47 = vector.broadcast %46 : vector<128x1xf32> to vector<128x8xf32>
    %48 = arith.addf %45, %47 : vector<128x8xf32>
    %cst_32 = arith.constant 0.000000e+00 : f32
    %49 = vector.broadcast %cst_32 : f32 to vector<128x8xf32>
    %50 = arith.maximumf %48, %49 : vector<128x8xf32>
    %c0_33 = arith.constant 0 : index
    %c0_34 = arith.constant 0 : index
    %51 = vector.load %arg11[%c0_33, %c0_34] : memref<128x1xf32, #tpu.memory_space<vmem>>, vector<128x1xf32>
    %52 = vector.broadcast %51 : vector<128x1xf32> to vector<128x8xf32>
    %53 = arith.mulf %50, %52 : vector<128x8xf32>
    %cst_35 = arith.constant dense<0.000000e+00> : vector<8xf32>
    %54 = vector.multi_reduction <add>, %53, %cst_35 [0] : vector<128x8xf32> to vector<8xf32>
    %55 = vector.shape_cast %54 : vector<8xf32> to vector<1x8xf32>
    %c0_36 = arith.constant 0 : index
    %c0_37 = arith.constant 0 : index
    %56 = vector.load %arg12[%c0_36, %c0_37] : memref<1x1xf32, #tpu.memory_space<vmem>>, vector<1x1xf32>
    %57 = vector.broadcast %56 : vector<1x1xf32> to vector<1x8xf32>
    %58 = arith.addf %55, %57 : vector<1x8xf32>
    %c0_38 = arith.constant 0 : index
    %c0_39 = arith.constant 0 : index
    %59 = vector.load %arg13[%c0_38, %c0_39] : memref<1x8xf32, #tpu.memory_space<vmem>>, vector<1x8xf32>
    tpu.vector_store %arg13[%c0_38, %c0_39], %58 {strides = array<i32>} : memref<1x8xf32, #tpu.memory_space<vmem>>, vector<1x8xf32>,
    return
  }
}

</mosaic_0001>

<bundles_post_ra>
// kernel: tpu_custom_call.1
= control target key start
LH: loop header
LB: loop body
LE: loop exit
PB: predicated region body
PF: predicated region fallthrough
CT: control target
= control target key end

     0   :  { %s3101_s0 = inlined_call_operand.vmem [shape: f32[16,8], index: 0, kind: input, shape index: {}]   ;;  %s3102_s1 = inlined_call_operand.vmem [shape: f32[4,8], index: 1, kind: input, shape index: {}]   ;;  %s3103_s2 = inlined_call_operand.vmem [shape: f32[128,16], index: 2, kind: input, shape index: {}]   ;;  %s3104_s3 = inlined_call_operand.vmem [shape: f32[128,1], index: 3, kind: input, shape index: {}]   ;;  %s3105_s4 = inlined_call_operand.vmem [shape: f32[128,1], index: 4, kind: input, shape index: {}]   ;;  %s3106_s5 = inlined_call_operand.vmem [shape: f32[128,1], index: 5, kind: input, shape index: {}]   ;;  %s3107_s6 = inlined_call_operand.vmem [shape: f32[128,128], index: 6, kind: input, shape index: {}]   ;;  %s3108_s7 = inlined_call_operand.vmem [shape: f32[128,4], index: 7, kind: input, shape index: {}]   ;;  %s3109_s8 = inlined_call_operand.vmem [shape: f32[128,1], index: 8, kind: input, shape index: {}]   ;;  %s3110_s9 = inlined_call_operand.vmem [shape: f32[128,128], index: 9, kind: input, shape index: {}]   ;;  %s3111_s10 = inlined_call_operand.vmem [shape: f32[128,1], index: 10, kind: input, shape index: {}]   ;;  %s3112_s11 = inlined_call_operand.vmem [shape: f32[128,1], index: 11, kind: input, shape index: {}]   ;;  %s3113_s12 = inlined_call_operand.<no memory space> [shape: f32[1,1], index: 12, kind: input, shape index: {}]   ;;  %s3114_s13 = inlined_call_operand.hbm [shape: f32[1,8], index: 13, kind: output, shape index: {}]  }
   0x1   :  { %v18_v0 = vstv %s3113_s12 }
   0x2   :  { %19 = vst [vmem:[#allocation2] sm:$0x1] %v18_v0 }
   0x3   :  { %v63_v1 = vld [vmem:[%s3101_s0] sm:$0xff]  ;;  %v64_v2 = vld [vmem:[%s3101_s0 + $0x8] sm:$0xff]  ;;  %vm161_vm0 = vcmask 130048   ;;  %v2263_v5 = vmov 0   ;;  %v49_v7 = vld [vmem:[%s3103_s2 + $0x10] sm:$0xff] }
   0x4   :  { %v47_v3 = vld [vmem:[%s3103_s2] sm:$0xff]  ;;  %v2119_v4 = vpack.c.bf16 %v64_v2, %v63_v1  ;;  %2205 = vset.pattern.permute.xlu0 %v2263_v5  ;;  %2206 = vset.pattern.permute.xlu1 %v2263_v5  ;;  %v48_v6 = vld [vmem:[%s3103_s2 + $0x8] sm:$0xff]  ;;  %v67_v9 = vld [vmem:[%s3104_s3 + $0x10] sm:$0xff] }
   0x5   :  { %1957 = vmatprep.mubr.msk.f32.mxu0 %vm161_vm0, %v47_v3  ;;  %v65_v8 = vld [vmem:[%s3104_s3] sm:$0xff]  ;;  %v50_v10 = vld [vmem:[%s3103_s2 + $0x18] sm:$0xff]  ;;  %v66_v11 = vld [vmem:[%s3104_s3 + $0x8] sm:$0xff]  ;;  %93 = vperm.xlu1 %2206, %v67_v9  }
   0x6   :  { %2120 = vmatprep.subr.bf16.mxu0 %v2119_v4  ;;  %83 = vperm.xlu0 %2205, %v65_v8   ;;  %v51_v12 = vld [vmem:[%s3103_s2 + $0x20] sm:$0xff]  ;;  %v68_v13 = vld [vmem:[%s3104_s3 + $0x18] sm:$0xff] }
   0x7   :  { %2122 = vmatpush3.bf16.msra.mxu0 %v2119_v4 }
   0xa   :  { %1958 = vmatmul.mubr.msk.f32.vlgmr.msra.gmra.mrb[0].mxu0 %vm161_vm0, %v48_v6  ;;  %88 = vperm.xlu0 %2205, %v66_v11  }
   0xb   :  { %1960 = vmatprep.mubr.msk.f32.mxu0 %vm161_vm0, %v49_v7 }
   0xe   :  { %1961 = vmatmul.mubr.msk.f32.gmra.mrb[2].mxu0 %vm161_vm0, %v50_v10 }
   0xf   :  { %20 = vsyncpa [#allocation4], 0  ;;  %1963 = vmatprep.mubr.msk.f32.mxu0 %vm161_vm0, %v51_v12  ;;  %v52_v14 = vld [vmem:[%s3103_s2 + $0x28] sm:$0xff]  ;;  %v69_v15 = vld [vmem:[%s3104_s3 + $0x20] sm:$0xff]  ;;  %98 = vperm.xlu1 %2206, %v68_v13   ;;  %vm355_vm1 = vcmask 64512   ;;  %vm950_vm2 = vcmask 1043456  }
  0x10   :  { %v53_v16 = vld [vmem:[%s3103_s2 + $0x30] sm:$0xff]  ;;  %v70_v17 = vld [vmem:[%s3104_s3 + $0x28] sm:$0xff]  ;;  %103 = vperm.xlu0 %2205, %v69_v15   ;;  %v54_v18 = vld [vmem:[%s3103_s2 + $0x38] sm:$0xff]  ;;  %vm901_vm3 = vcmask 31744   ;;  %vm1805_vm4 = vcmask 57344  }
  0x11   :  { %v71_v19 = vld [vmem:[%s3104_s3 + $0x30] sm:$0xff]  ;;  %v55_v20 = vld [vmem:[%s3103_s2 + $0x40] sm:$0xff]  ;;  %v72_v21 = vld [vmem:[%s3104_s3 + $0x38] sm:$0xff] }
  0x12   :  { %1964 = vmatmul.mubr.msk.f32.gmra.mrb[4].mxu0 %vm161_vm0, %v52_v14  ;;  %v56_v22 = vld [vmem:[%s3103_s2 + $0x48] sm:$0xff]  ;;  %v73_v23 = vld [vmem:[%s3104_s3 + $0x40] sm:$0xff]  ;;  %v57_v24 = vld [vmem:[%s3103_s2 + $0x50] sm:$0xff] }
  0x13   :  { %1966 = vmatprep.mubr.msk.f32.mxu0 %vm161_vm0, %v53_v16  ;;  %108 = vperm.xlu1 %2206, %v70_v17   ;;  %v74_v25 = vld [vmem:[%s3104_s3 + $0x48] sm:$0xff]  ;;  %v58_v26 = vld [vmem:[%s3103_s2 + $0x58] sm:$0xff]  ;;  %v75_v27 = vld [vmem:[%s3104_s3 + $0x50] sm:$0xff] }
  0x14   :  { %113 = vperm.xlu0 %2205, %v71_v19   ;;  %v59_v28 = vld [vmem:[%s3103_s2 + $0x60] sm:$0xff]  ;;  %v76_v29 = vld [vmem:[%s3104_s3 + $0x58] sm:$0xff]  ;;  %v60_v30 = vld [vmem:[%s3103_s2 + $0x68] sm:$0xff] }
  0x15   :  { %v77_v31 = vld [vmem:[%s3104_s3 + $0x60] sm:$0xff]  ;;  %v61_v32 = vld [vmem:[%s3103_s2 + $0x70] sm:$0xff]  ;;  %v78_v33 = vld [vmem:[%s3104_s3 + $0x68] sm:$0xff] }
  0x16   :  { %1967 = vmatmul.mubr.msk.f32.gmra.mrb[6].mxu0 %vm161_vm0, %v54_v18  ;;  %v62_v34 = vld [vmem:[%s3103_s2 + $0x78] sm:$0xff]  ;;  %v79_v35 = vld [vmem:[%s3104_s3 + $0x70] sm:$0xff] }
  0x17   :  { %1969 = vmatprep.mubr.msk.f32.mxu0 %vm161_vm0, %v55_v20  ;;  %118 = vperm.xlu1 %2206, %v72_v21   ;;  %v80_v36 = vld [vmem:[%s3104_s3 + $0x78] sm:$0xff] }
  0x18   :  { %123 = vperm.xlu0 %2205, %v73_v23  }
  0x1a   :  { %1970 = vmatmul.mubr.msk.f32.gmra.mrb[8].mxu0 %vm161_vm0, %v56_v22 }
  0x1b   :  { %1972 = vmatprep.mubr.msk.f32.mxu0 %vm161_vm0, %v57_v24  ;;  %128 = vperm.xlu1 %2206, %v74_v25  }
  0x1c   :  { %133 = vperm.xlu0 %2205, %v75_v27  }
  0x1e   :  { %1973 = vmatmul.mubr.msk.f32.gmra.mrb[10].mxu0 %vm161_vm0, %v58_v26 }
  0x1f   :  { %1975 = vmatprep.mubr.msk.f32.mxu0 %vm161_vm0, %v59_v28  ;;  %138 = vperm.xlu1 %2206, %v76_v29  }
  0x20   :  { %143 = vperm.xlu0 %2205, %v77_v31  }
  0x22   :  { %1976 = vmatmul.mubr.msk.f32.gmra.mrb[12].mxu0 %vm161_vm0, %v60_v30 }
  0x23   :  { %1978 = vmatprep.mubr.msk.f32.mxu0 %vm161_vm0, %v61_v32  ;;  %148 = vperm.xlu1 %2206, %v78_v33  }
  0x24   :  { %153 = vperm.xlu0 %2205, %v79_v35  }
  0x26   :  { %1979 = vmatmul.mubr.msk.f32.gmra.mrb[14].mxu0 %vm161_vm0, %v62_v34 }
  0x27   :  { %158 = vperm.xlu1 %2206, %v80_v36  }
  0x84   :  { %v94_v47 = vpop.permute.xlu1 %93 }
  0x85   :  { %v84_v37 = vpop.permute.xlu0 %83 }
  0x89   :  { %v89_v38 = vpop.permute.xlu0 %88 }
  0x8e   :  { %v99_v58 = vpop.permute.xlu1 %98 }
  0x8f   :  { %v104_v57 = vpop.permute.xlu0 %103 }
  0x92   :  { %v109_v7 = vpop.permute.xlu1 %108 }
  0x93   :  { %v114_v6 = vpop.permute.xlu0 %113 }
  0x96   :  { %v119_v21 = vpop.permute.xlu1 %118 }
  0x97   :  { %v124_v20 = vpop.permute.xlu0 %123 }
  0x9a   :  { %v129_v33 = vpop.permute.xlu1 %128 }
  0x9b   :  { %v134_v32 = vpop.permute.xlu0 %133 }
  0xdd   :  { %v1959_v39 = vpop.f32.mrb[0].mxu0 }
  0xde   :  { %v2456_v40 = vadd.f32 %v1959_v39, %v89_v38  ;;  %v276_v41 = vpop.f32.mrb[1].mxu0 }
  0xdf   :  { %v2458_v42 = vadd.f32 %v276_v41, %v84_v37 }
  0xe0   :  { %v359_v43 = vsel %vm355_vm1, %v2456_v40, 0.0  ;;  %v421_v46 = vmul.f32 %v2456_v40, %v2456_v40 }
  0xe1   :  { %360 = vadd.xlane.f32.xlu1 %v359_v43  ;;  %v1962_v44 = vpop.f32.mrb[2].mxu0  ;;  %v356_v45 = vsel %vm355_vm1, %v2458_v42, 0.0  ;;  %v420_v54 = vmul.f32 %v2458_v42, %v2458_v42 }
  0xe2   :  { %v286_v48 = vpop.f32.mrb[3].mxu0  ;;  %357 = vadd.xlane.f32.xlu0 %v356_v45  ;;  %v439_v52 = vsel %vm355_vm1, %v421_v46, 0.0  ;;  %v2476_v59 = vadd.f32 %v1962_v44, %v99_v58  ;;  %v144_v44 = vpop.permute.xlu0 %143 }
  0xe3   :  { %v2466_v49 = vadd.f32 %v286_v48, %v94_v47  ;;  %v436_v62 = vsel %vm355_vm1, %v420_v54, 0.0  ;;  %v139_v45 = vpop.permute.xlu1 %138 }
  0xe4   :  { %v365_v2 = vsel %vm355_vm1, %v2476_v59, 0.0  ;;  %v423_v4 = vmul.f32 %v2476_v59, %v2476_v59 }
  0xe5   :  { %v1965_v50 = vpop.f32.mrb[4].mxu0  ;;  %v362_v51 = vsel %vm355_vm1, %v2466_v49, 0.0  ;;  %v422_v53 = vmul.f32 %v2466_v49, %v2466_v49 }
  0xe6   :  { %v296_v55 = vpop.f32.mrb[5].mxu0  ;;  %363 = vadd.xlane.f32.xlu1 %v362_v51  ;;  %440 = vadd.xlane.f32.xlu0 %v439_v52  ;;  %v2489_v8 = vadd.f32 %v1965_v50, %v109_v7  ;;  %v445_v12 = vsel %vm355_vm1, %v423_v4, 0.0 }
  0xe7   :  { %v442_v56 = vsel %vm355_vm1, %v422_v53, 0.0  ;;  %v2478_v60 = vadd.f32 %v296_v55, %v104_v57  ;;  %v154_v55 = vpop.permute.xlu0 %153 }
  0xe8   :  { %v371_v16 = vsel %vm355_vm1, %v2489_v8, 0.0  ;;  %v425_v18 = vmul.f32 %v2489_v8, %v2489_v8 }
  0xe9   :  { %v1968_v61 = vpop.f32.mrb[6].mxu0  ;;  %v368_v1 = vsel %vm355_vm1, %v2478_v60, 0.0  ;;  %v424_v3 = vmul.f32 %v2478_v60, %v2478_v60 }
  0xea   :  { %v306_v63 = vpop.f32.mrb[7].mxu0  ;;  %443 = vadd.xlane.f32.xlu1 %v442_v56  ;;  %437 = vadd.xlane.f32.xlu0 %v436_v62  ;;  %v2503_v22 = vadd.f32 %v1968_v61, %v119_v21  ;;  %v451_v26 = vsel %vm355_vm1, %v425_v18, 0.0  ;;  %v149_v56 = vpop.permute.xlu1 %148 }
  0xeb   :  { %v2491_v9 = vadd.f32 %v306_v63, %v114_v6  ;;  %v448_v11 = vsel %vm355_vm1, %v424_v3, 0.0 }
  0xec   :  { %v377_v29 = vsel %vm355_vm1, %v2503_v22, 0.0  ;;  %v427_v31 = vmul.f32 %v2503_v22, %v2503_v22 }
  0xed   :  { %v1971_v0 = vpop.f32.mrb[8].mxu0  ;;  %v374_v15 = vsel %vm355_vm1, %v2491_v9, 0.0  ;;  %v426_v17 = vmul.f32 %v2491_v9, %v2491_v9 }
  0xee   :  { %v316_v5 = vpop.f32.mrb[9].mxu0  ;;  %369 = vadd.xlane.f32.xlu1 %v368_v1  ;;  %366 = vadd.xlane.f32.xlu0 %v365_v2  ;;  %v2517_v34 = vadd.f32 %v1971_v0, %v129_v33  ;;  %v457_v37 = vsel %vm355_vm1, %v427_v31, 0.0  ;;  %v159_v3 = vpop.permute.xlu1 %158 }
  0xef   :  { %v2505_v23 = vadd.f32 %v316_v5, %v124_v20  ;;  %v454_v25 = vsel %vm355_vm1, %v426_v17, 0.0 }
  0xf0   :  { %v383_v39 = vsel %vm355_vm1, %v2517_v34, 0.0  ;;  %v429_v43 = vmul.f32 %v2517_v34, %v2517_v34 }
  0xf1   :  { %v1974_v10 = vpop.f32.mrb[10].mxu0  ;;  %v380_v28 = vsel %vm355_vm1, %v2505_v23, 0.0  ;;  %v428_v30 = vmul.f32 %v2505_v23, %v2505_v23 }
  0xf2   :  { %v326_v13 = vpop.f32.mrb[11].mxu0  ;;  %449 = vadd.xlane.f32.xlu1 %v448_v11  ;;  %446 = vadd.xlane.f32.xlu0 %v445_v12  ;;  %v2531_v46 = vadd.f32 %v1974_v10, %v139_v45  ;;  %v463_v50 = vsel %vm355_vm1, %v429_v43, 0.0 }
  0xf3   :  { %v2519_v35 = vadd.f32 %v326_v13, %v134_v32  ;;  %v460_v36 = vsel %vm355_vm1, %v428_v30, 0.0 }
  0xf4   :  { %v389_v52 = vsel %vm355_vm1, %v2531_v46, 0.0  ;;  %v431_v54 = vmul.f32 %v2531_v46, %v2531_v46 }
  0xf5   :  { %v1977_v14 = vpop.f32.mrb[12].mxu0  ;;  %v386_v38 = vsel %vm355_vm1, %v2519_v35, 0.0  ;;  %v430_v41 = vmul.f32 %v2519_v35, %v2519_v35 }
  0xf6   :  { %v336_v19 = vpop.f32.mrb[13].mxu0  ;;  %375 = vadd.xlane.f32.xlu1 %v374_v15  ;;  %372 = vadd.xlane.f32.xlu0 %v371_v16  ;;  %v2545_v57 = vadd.f32 %v1977_v14, %v149_v56  ;;  %v469_v62 = vsel %vm355_vm1, %v431_v54, 0.0 }
  0xf7   :  { %v2533_v47 = vadd.f32 %v336_v19, %v144_v44  ;;  %v466_v48 = vsel %vm355_vm1, %v430_v41, 0.0 }
  0xf8   :  { %v395_v0 = vsel %vm355_vm1, %v2545_v57, 0.0  ;;  %v433_v2 = vmul.f32 %v2545_v57, %v2545_v57 }
  0xf9   :  { %v1980_v24 = vpop.f32.mrb[14].mxu0  ;;  %v392_v51 = vsel %vm355_vm1, %v2533_v47, 0.0  ;;  %v432_v53 = vmul.f32 %v2533_v47, %v2533_v47 }
  0xfa   :  { %v346_v27 = vpop.f32.mrb[15].mxu0  ;;  %455 = vadd.xlane.f32.xlu1 %v454_v25  ;;  %452 = vadd.xlane.f32.xlu0 %v451_v26  ;;  %v2559_v4 = vadd.f32 %v1980_v24, %v159_v3  ;;  %v475_v6 = vsel %vm355_vm1, %v433_v2, 0.0  ;;  %v533_v3 = vld [vmem:[%s3105_s4 + $0x8] sm:$0xff] }
  0xfb   :  { %v2547_v58 = vadd.f32 %v346_v27, %v154_v55  ;;  %v472_v61 = vsel %vm355_vm1, %v432_v53, 0.0 }
  0xfc   :  { %v401_v7 = vsel %vm355_vm1, %v2559_v4, 0.0  ;;  %v435_v10 = vmul.f32 %v2559_v4, %v2559_v4 }
  0xfd   :  { %v398_v63 = vsel %vm355_vm1, %v2547_v58, 0.0  ;;  %v434_v1 = vmul.f32 %v2547_v58, %v2547_v58 }
  0xfe   :  { %381 = vadd.xlane.f32.xlu1 %v380_v28  ;;  %378 = vadd.xlane.f32.xlu0 %v377_v29  ;;  %v481_v11 = vsel %vm355_vm1, %v435_v10, 0.0 }
  0xff   :  { %v478_v5 = vsel %vm355_vm1, %v434_v1, 0.0 }
 0x102   :  { %461 = vadd.xlane.f32.xlu1 %v460_v36  ;;  %458 = vadd.xlane.f32.xlu0 %v457_v37 }
 0x106   :  { %387 = vadd.xlane.f32.xlu1 %v386_v38  ;;  %384 = vadd.xlane.f32.xlu0 %v383_v39 }
 0x10a   :  { %467 = vadd.xlane.f32.xlu1 %v466_v48  ;;  %464 = vadd.xlane.f32.xlu0 %v463_v50 }
 0x10e   :  { %393 = vadd.xlane.f32.xlu1 %v392_v51  ;;  %390 = vadd.xlane.f32.xlu0 %v389_v52 }
 0x112   :  { %473 = vadd.xlane.f32.xlu1 %v472_v61  ;;  %470 = vadd.xlane.f32.xlu0 %v469_v62 }
 0x116   :  { %399 = vadd.xlane.f32.xlu1 %v398_v63  ;;  %396 = vadd.xlane.f32.xlu0 %v395_v0 }
 0x11a   :  { %479 = vadd.xlane.f32.xlu1 %v478_v5  ;;  %476 = vadd.xlane.f32.xlu0 %v475_v6 }
 0x11e   :  { %402 = vadd.xlane.f32.xlu0 %v401_v7 }
 0x122   :  { %482 = vadd.xlane.f32.xlu0 %v481_v11 }
 0x16e   :  { %v361_v12 = vpop.xlane.xlu1 %360 }
 0x16f   :  { %v358_v13 = vpop.xlane.xlu0 %357  ;;  %v2568_v14 = vmul.f32 0.125, %v361_v12 }
 0x170   :  { %v2572_v18 = vmul.f32 0.125, %v358_v13 }
 0x171   :  { %v501_v17 = vmul.f32 %v2568_v14, %v2568_v14 }
 0x172   :  { %v500_v27 = vmul.f32 %v2572_v18, %v2572_v18 }
 0x173   :  { %v364_v15 = vpop.xlane.xlu1 %363  ;;  %v441_v16 = vpop.xlane.xlu0 %440 }
 0x174   :  { %v2574_v19 = vmul.f32 0.125, %v364_v15  ;;  %v485_v20 = vmul.f32 0.125, %v441_v16 }
 0x176   :  { %v502_v21 = vmul.f32 %v2574_v19, %v2574_v19  ;;  %v517_v24 = vsub.f32 %v485_v20, %v501_v17  ;;  %v534_v20 = vld [vmem:[%s3105_s4 + $0x10] sm:$0xff] }
 0x177   :  { %v444_v25 = vpop.xlane.xlu1 %443  ;;  %v438_v26 = vpop.xlane.xlu0 %437 }
 0x178   :  { %v565_v28 = vmax.f32 %v517_v24, 0.0  ;;  %v486_v29 = vmul.f32 0.125, %v444_v25  ;;  %v484_v30 = vmul.f32 0.125, %v438_v26  ;;  %v532_v26 = vld [vmem:[%s3105_s4] sm:$0xff] }
 0x17a   :  { %v581_v31 = vadd.f32 1e-05, %v565_v28  ;;  %v518_v32 = vsub.f32 %v486_v29, %v502_v21  ;;  %v516_v33 = vsub.f32 %v484_v30, %v500_v27 }
 0x17b   :  { %v370_v36 = vpop.xlane.xlu1 %369  ;;  %v367_v37 = vpop.xlane.xlu0 %366 }
 0x17c   :  { %2207 = vrsqrt.f32 %v581_v31  ;;  %v566_v38 = vmax.f32 %v518_v32, 0.0  ;;  %v564_v39 = vmax.f32 %v516_v33, 0.0  ;;  %v2580_v41 = vmul.f32 0.125, %v370_v36 }
 0x17d   :  { %v2582_v43 = vmul.f32 0.125, %v367_v37  ;;  %v550_v37 = vld [vmem:[%s3106_s5 + $0x10] sm:$0xff] }
 0x17e   :  { %v582_v44 = vadd.f32 1e-05, %v566_v38  ;;  %v580_v45 = vadd.f32 1e-05, %v564_v39  ;;  %v504_v48 = vmul.f32 %v2580_v41, %v2580_v41 }
 0x17f   :  { %v450_v50 = vpop.xlane.xlu1 %449  ;;  %v447_v51 = vpop.xlane.xlu0 %446  ;;  %v503_v52 = vmul.f32 %v2582_v43, %v2582_v43 }
 0x180   :  { %2209 = vrsqrt.f32 %v582_v44  ;;  %v488_v53 = vmul.f32 0.125, %v450_v50  ;;  %v487_v54 = vmul.f32 0.125, %v447_v51  ;;  %v549_v50 = vld [vmem:[%s3106_s5 + $0x8] sm:$0xff] }
 0x181   :  { %2211 = vrsqrt.f32 %v580_v45 }
 0x182   :  { %v520_v55 = vsub.f32 %v488_v53, %v504_v48  ;;  %v519_v56 = vsub.f32 %v487_v54, %v503_v52 }
 0x183   :  { %v376_v61 = vpop.xlane.xlu1 %375  ;;  %v373_v62 = vpop.xlane.xlu0 %372 }
 0x184   :  { %v568_v63 = vmax.f32 %v520_v55, 0.0  ;;  %v567_v0 = vmax.f32 %v519_v56, 0.0  ;;  %v2588_v1 = vmul.f32 0.125, %v376_v61  ;;  %v2590_v2 = vmul.f32 0.125, %v373_v62 }
 0x186   :  { %v2208_v5 = vpop.eup %2207  ;;  %v584_v6 = vadd.f32 1e-05, %v568_v63  ;;  %v583_v7 = vadd.f32 1e-05, %v567_v0  ;;  %v506_v10 = vmul.f32 %v2588_v1, %v2588_v1  ;;  %v505_v15 = vmul.f32 %v2590_v2, %v2590_v2 }
 0x187   :  { %v456_v11 = vpop.xlane.xlu1 %455  ;;  %v453_v12 = vpop.xlane.xlu0 %452  ;;  %v613_v13 = vmul.f32 %v2208_v5, %v533_v3  ;;  %v535_v3 = vld [vmem:[%s3105_s4 + $0x18] sm:$0xff] }
 0x188   :  { %2213 = vrsqrt.f32 %v584_v6  ;;  %v490_v16 = vmul.f32 0.125, %v456_v11  ;;  %v489_v17 = vmul.f32 0.125, %v453_v12 }
 0x189   :  { %2215 = vrsqrt.f32 %v583_v7  ;;  %667 = vperm.xlu0 %2205, %v613_v13   ;;  %v629_v44 = vmul.f32 %v613_v13, %v2568_v14  ;;  %v536_v14 = vld [vmem:[%s3105_s4 + $0x20] sm:$0xff] }
 0x18a   :  { %v2210_v21 = vpop.eup %2209  ;;  %v522_v24 = vsub.f32 %v490_v16, %v506_v10  ;;  %v521_v25 = vsub.f32 %v489_v17, %v505_v15  ;;  %v552_v16 = vld [vmem:[%s3106_s5 + $0x20] sm:$0xff] }
 0x18b   :  { %v2212_v27 = vpop.eup %2211  ;;  %v382_v28 = vpop.xlane.xlu1 %381  ;;  %v614_v30 = vmul.f32 %v2210_v21, %v534_v20  ;;  %v645_v61 = vsub.f32 %v549_v50, %v629_v44  ;;  %v537_v50 = vld [vmem:[%s3105_s4 + $0x28] sm:$0xff] }
 0x18c   :  { %v379_v29 = vpop.xlane.xlu0 %378  ;;  %v570_v31 = vmax.f32 %v522_v24, 0.0  ;;  %v569_v32 = vmax.f32 %v521_v25, 0.0  ;;  %v2605_v33 = vmul.f32 0.125, %v382_v28  ;;  %v612_v38 = vmul.f32 %v2212_v27, %v532_v26  ;;  %v548_v26 = vld [vmem:[%s3106_s5] sm:$0xff] }
 0x18d   :  { %v2607_v36 = vmul.f32 0.125, %v379_v29  ;;  %672 = vperm.xlu0 %2205, %v614_v30   ;;  %v630_v39 = vmul.f32 %v614_v30, %v2574_v19 }
 0x18e   :  { %v586_v45 = vadd.f32 1e-05, %v570_v31  ;;  %v585_v48 = vadd.f32 1e-05, %v569_v32  ;;  %v508_v51 = vmul.f32 %v2605_v33, %v2605_v33  ;;  %662 = vperm.xlu1 %2206, %v612_v38   ;;  %v628_v21 = vmul.f32 %v612_v38, %v2572_v18  ;;  %v538_v18 = vld [vmem:[%s3105_s4 + $0x30] sm:$0xff] }
 0x18f   :  { %v462_v52 = vpop.xlane.xlu1 %461  ;;  %v646_v54 = vsub.f32 %v550_v37, %v630_v39  ;;  %v507_v55 = vmul.f32 %v2607_v36, %v2607_v36 }
 0x190   :  { %v459_v53 = vpop.xlane.xlu0 %458  ;;  %2217 = vrsqrt.f32 %v586_v45  ;;  %v492_v19 = vmul.f32 0.125, %v462_v52  ;;  %v644_v37 = vsub.f32 %v548_v26, %v628_v21 }
 0x191   :  { %v491_v56 = vmul.f32 0.125, %v459_v53  ;;  %2219 = vrsqrt.f32 %v585_v48  ;;  %768 = vperm.xlu0 %2205, %v646_v54   ;;  %v551_v48 = vld [vmem:[%s3106_s5 + $0x18] sm:$0xff] }
 0x192   :  { %v2214_v62 = vpop.eup %2213  ;;  %v524_v63 = vsub.f32 %v492_v19, %v508_v51  ;;  %763 = vperm.xlu1 %2206, %v645_v61  }
 0x193   :  { %v523_v0 = vsub.f32 %v491_v56, %v507_v55  ;;  %v2216_v5 = vpop.eup %2215  ;;  %v388_v6 = vpop.xlane.xlu1 %387  ;;  %v616_v10 = vmul.f32 %v2214_v62, %v536_v14  ;;  %v554_v14 = vld [vmem:[%s3106_s5 + $0x30] sm:$0xff] }
 0x194   :  { %v385_v7 = vpop.xlane.xlu0 %384  ;;  %v572_v11 = vmax.f32 %v524_v63, 0.0  ;;  %v2627_v13 = vmul.f32 0.125, %v388_v6  ;;  %v615_v17 = vmul.f32 %v2216_v5, %v535_v3  ;;  %v900_v5 = vld [vmem:[%s3102_s1] sm:$0xf] }
 0x195   :  { %v571_v12 = vmax.f32 %v523_v0, 0.0  ;;  %v2629_v15 = vmul.f32 0.125, %v385_v7  ;;  %682 = vperm.xlu0 %2205, %v616_v10   ;;  %v632_v20 = vmul.f32 %v616_v10, %v2580_v41  ;;  %1981 = vmatprep.subr.msk.mxu1 %vm950_vm2, %v900_v5 }
 0x196   :  { %v588_v24 = vadd.f32 1e-05, %v572_v11  ;;  %v510_v27 = vmul.f32 %v2627_v13, %v2627_v13  ;;  %677 = vperm.xlu1 %2206, %v615_v17   ;;  %v631_v38 = vmul.f32 %v615_v17, %v2582_v43  ;;  %v540_v17 = vld [vmem:[%s3105_s4 + $0x40] sm:$0xff]  ;;  %1982 = vmatpush3.msk.msra.mxu1 %vm950_vm2, %v900_v5  ;;  %v555_v5 = vld [vmem:[%s3106_s5 + $0x38] sm:$0xff] }
 0x197   :  { %v587_v25 = vadd.f32 1e-05, %v571_v12  ;;  %v468_v28 = vpop.xlane.xlu1 %467  ;;  %v648_v30 = vsub.f32 %v552_v16, %v632_v20  ;;  %v509_v31 = vmul.f32 %v2629_v15, %v2629_v15  ;;  %v884_v20 = vld [vmem:[%s3108_s7] sm:$0xff] }
 0x198   :  { %v465_v29 = vpop.xlane.xlu0 %464  ;;  %2221 = vrsqrt.f32 %v588_v24  ;;  %v494_v41 = vmul.f32 0.125, %v468_v28  ;;  %v647_v61 = vsub.f32 %v551_v48, %v631_v38  ;;  %v885_v24 = vld [vmem:[%s3108_s7 + $0x8] sm:$0xff]  ;;  %1983 = vmatprep.mubr.msk.f32.mxu1 %vm901_vm3, %v884_v20 }
 0x199   :  { %v493_v32 = vmul.f32 0.125, %v465_v29  ;;  %2223 = vrsqrt.f32 %v587_v25  ;;  %778 = vperm.xlu0 %2205, %v648_v30   ;;  %v553_v28 = vld [vmem:[%s3106_s5 + $0x28] sm:$0xff]  ;;  %v539_v29 = vld [vmem:[%s3105_s4 + $0x38] sm:$0xff]  ;;  %1984 = vmatmul.mubr.msk.f32.vlgmr.msra.gmra.mrb[0].mxu1 %vm901_vm3, %v885_v24 }
 0x19a   :  { %v2218_v39 = vpop.eup %2217  ;;  %v526_v44 = vsub.f32 %v494_v41, %v510_v27  ;;  %758 = vperm.xlu1 %2206, %v644_v37  }
 0x19b   :  { %v525_v45 = vsub.f32 %v493_v32, %v509_v31  ;;  %v2220_v51 = vpop.eup %2219  ;;  %v394_v52 = vpop.xlane.xlu1 %393  ;;  %v618_v54 = vmul.f32 %v2218_v39, %v538_v18  ;;  %v556_v39 = vld [vmem:[%s3106_s5 + $0x40] sm:$0xff] }
 0x19c   :  { %v391_v53 = vpop.xlane.xlu0 %390  ;;  %v574_v55 = vmax.f32 %v526_v44, 0.0  ;;  %v2653_v56 = vmul.f32 0.125, %v394_v52  ;;  %v617_v63 = vmul.f32 %v2220_v51, %v537_v50 }
 0x19d   :  { %v573_v19 = vmax.f32 %v525_v45, 0.0  ;;  %v2655_v43 = vmul.f32 0.125, %v391_v53  ;;  %692 = vperm.xlu0 %2205, %v618_v54   ;;  %v634_v62 = vmul.f32 %v618_v54, %v2588_v1 }
 0x19e   :  { %v590_v0 = vadd.f32 1e-05, %v574_v55  ;;  %v512_v6 = vmul.f32 %v2653_v56, %v2653_v56  ;;  %773 = vperm.xlu1 %2206, %v647_v61   ;;  %v633_v21 = vmul.f32 %v617_v63, %v2590_v2 }
 0x19f   :  { %v589_v3 = vadd.f32 1e-05, %v573_v19  ;;  %v511_v7 = vmul.f32 %v2655_v43, %v2655_v43  ;;  %v474_v10 = vpop.xlane.xlu1 %473  ;;  %v650_v12 = vsub.f32 %v554_v14, %v634_v62 }
 0x1a0   :  { %v471_v11 = vpop.xlane.xlu0 %470  ;;  %2225 = vrsqrt.f32 %v590_v0  ;;  %v496_v1 = vmul.f32 0.125, %v474_v10  ;;  %v649_v44 = vsub.f32 %v553_v28, %v633_v21 }
 0x1a1   :  { %v495_v16 = vmul.f32 0.125, %v471_v11  ;;  %2227 = vrsqrt.f32 %v589_v3  ;;  %788 = vperm.xlu0 %2205, %v650_v12  }
 0x1a2   :  { %v2222_v25 = vpop.eup %2221  ;;  %v528_v26 = vsub.f32 %v496_v1, %v512_v6  ;;  %687 = vperm.xlu1 %2206, %v617_v63   ;;  %v541_v6 = vld [vmem:[%s3105_s4 + $0x48] sm:$0xff] }
 0x1a3   :  { %v527_v27 = vsub.f32 %v495_v16, %v511_v7  ;;  %v2224_v30 = vpop.eup %2223  ;;  %v400_v2 = vpop.xlane.xlu1 %399  ;;  %v620_v41 = vmul.f32 %v2222_v25, %v540_v17 }
 0x1a4   :  { %v397_v31 = vpop.xlane.xlu0 %396  ;;  %v576_v32 = vmax.f32 %v528_v26, 0.0  ;;  %v2686_v37 = vmul.f32 0.125, %v400_v2  ;;  %v619_v48 = vmul.f32 %v2224_v30, %v539_v29  ;;  %v544_v30 = vld [vmem:[%s3105_s4 + $0x60] sm:$0xff] }
 0x1a5   :  { %v575_v18 = vmax.f32 %v527_v27, 0.0  ;;  %v2688_v38 = vmul.f32 0.125, %v397_v31  ;;  %702 = vperm.xlu0 %2205, %v620_v41   ;;  %v636_v45 = vmul.f32 %v620_v41, %v2605_v33  ;;  %v542_v33 = vld [vmem:[%s3105_s4 + $0x50] sm:$0xff]  ;;  %v557_v41 = vld [vmem:[%s3106_s5 + $0x48] sm:$0xff] }
 0x1a6   :  { %v592_v50 = vadd.f32 1e-05, %v576_v32  ;;  %v514_v52 = vmul.f32 %v2686_v37, %v2686_v37  ;;  %783 = vperm.xlu1 %2206, %v649_v44   ;;  %v635_v62 = vmul.f32 %v619_v48, %v2607_v36  ;;  %v558_v36 = vld [vmem:[%s3106_s5 + $0x50] sm:$0xff]  ;;  %v543_v32 = vld [vmem:[%s3105_s4 + $0x58] sm:$0xff] }
 0x1a7   :  { %v591_v51 = vadd.f32 1e-05, %v575_v18  ;;  %v480_v53 = vpop.xlane.xlu1 %479  ;;  %v652_v55 = vsub.f32 %v556_v39, %v636_v45  ;;  %v513_v19 = vmul.f32 %v2688_v38, %v2688_v38  ;;  %v560_v45 = vld [vmem:[%s3106_s5 + $0x60] sm:$0xff] }
 0x1a8   :  { %v477_v54 = vpop.xlane.xlu0 %476  ;;  %2229 = vrsqrt.f32 %v592_v50  ;;  %v498_v14 = vmul.f32 0.125, %v480_v53  ;;  %v651_v17 = vsub.f32 %v555_v5, %v635_v62  ;;  %v546_v53 = vld [vmem:[%s3105_s4 + $0x70] sm:$0xff] }
 0x1a9   :  { %v497_v61 = vmul.f32 0.125, %v477_v54  ;;  %2231 = vrsqrt.f32 %v591_v51  ;;  %798 = vperm.xlu0 %2205, %v652_v55   ;;  %v562_v62 = vld [vmem:[%s3106_s5 + $0x70] sm:$0xff] }
 0x1aa   :  { %v2226_v63 = vpop.eup %2225  ;;  %v530_v0 = vsub.f32 %v498_v14, %v514_v52  ;;  %697 = vperm.xlu1 %2206, %v619_v48  }
 0x1ab   :  { %v529_v3 = vsub.f32 %v497_v61, %v513_v19  ;;  %v2228_v7 = vpop.eup %2227  ;;  %v622_v11 = vmul.f32 %v2226_v63, %v542_v33  ;;  %v559_v19 = vld [vmem:[%s3106_s5 + $0x58] sm:$0xff]  ;;  %v886_v33 = vld [vmem:[%s3108_s7 + $0x10] sm:$0xff] }
 0x1ac   :  { %v403_v10 = vpop.xlane.xlu0 %402  ;;  %v578_v12 = vmax.f32 %v530_v0, 0.0  ;;  %v621_v21 = vmul.f32 %v2228_v7, %v541_v6  ;;  %1986 = vmatprep.mubr.msk.f32.mxu1 %vm901_vm3, %v886_v33  ;;  %v888_v6 = vld [vmem:[%s3108_s7 + $0x20] sm:$0xff]  ;;  %v889_v7 = vld [vmem:[%s3108_s7 + $0x28] sm:$0xff] }
 0x1ad   :  { %v577_v1 = vmax.f32 %v529_v3, 0.0  ;;  %v2708_v16 = vmul.f32 0.125, %v403_v10  ;;  %712 = vperm.xlu0 %2205, %v622_v11   ;;  %v638_v20 = vmul.f32 %v622_v11, %v2627_v13  ;;  %v1244_v11 = vld [vmem:[%s3109_s8] sm:$0xff]  ;;  %v1646_v33 = vld [vmem:[%s3112_s11 + $0x8] sm:$0xff] }
 0x1ae   :  { %v594_v24 = vadd.f32 1e-05, %v578_v12  ;;  %793 = vperm.xlu1 %2206, %v651_v17   ;;  %v637_v2 = vmul.f32 %v621_v21, %v2629_v15  ;;  %v561_v12 = vld [vmem:[%s3106_s5 + $0x68] sm:$0xff] }
 0x1af   :  { %v593_v25 = vadd.f32 1e-05, %v577_v1  ;;  %v654_v27 = vsub.f32 %v558_v36, %v638_v20  ;;  %v515_v28 = vmul.f32 %v2708_v16, %v2708_v16  ;;  %v547_v1 = vld [vmem:[%s3105_s4 + $0x78] sm:$0xff] }
 0x1b0   :  { %v483_v26 = vpop.xlane.xlu0 %482  ;;  %2233 = vrsqrt.f32 %v594_v24  ;;  %v653_v15 = vsub.f32 %v557_v41, %v637_v2  ;;  %v891_v36 = vld [vmem:[%s3108_s7 + $0x38] sm:$0xff]  ;;  %v892_v24 = vld [vmem:[%s3108_s7 + $0x40] sm:$0xff]  ;;  %v1250_v2 = vld [vmem:[%s3109_s8 + $0x30] sm:$0xff] }
 0x1b1   :  { %v499_v29 = vmul.f32 0.125, %v483_v26  ;;  %2235 = vrsqrt.f32 %v593_v25  ;;  %808 = vperm.xlu0 %2205, %v654_v27   ;;  %v893_v25 = vld [vmem:[%s3108_s7 + $0x48] sm:$0xff]  ;;  %v1248_v27 = vld [vmem:[%s3109_s8 + $0x20] sm:$0xff] }
 0x1b2   :  { %v2230_v13 = vpop.eup %2229  ;;  %707 = vperm.xlu1 %2206, %v621_v21   ;;  %v1246_v21 = vld [vmem:[%s3109_s8 + $0x10] sm:$0xff]  ;;  %v897_v41 = vld [vmem:[%s3108_s7 + $0x68] sm:$0xff] }
 0x1b3   :  { %v531_v31 = vsub.f32 %v499_v29, %v515_v28  ;;  %v2232_v18 = vpop.eup %2231  ;;  %v624_v39 = vmul.f32 %v2230_v13, %v544_v30  ;;  %v563_v28 = vld [vmem:[%s3106_s5 + $0x78] sm:$0xff]  ;;  %v894_v29 = vld [vmem:[%s3108_s7 + $0x50] sm:$0xff]  ;;  %v896_v13 = vld [vmem:[%s3108_s7 + $0x60] sm:$0xff] }
 0x1b4   :  { %v623_v50 = vmul.f32 %v2232_v18, %v543_v32  ;;  %v895_v30 = vld [vmem:[%s3108_s7 + $0x58] sm:$0xff]  ;;  %v1252_v32 = vld [vmem:[%s3109_s8 + $0x40] sm:$0xff]  ;;  %v898_v18 = vld [vmem:[%s3108_s7 + $0x70] sm:$0xff] }
 0x1b5   :  { %v579_v44 = vmax.f32 %v531_v31, 0.0  ;;  %722 = vperm.xlu0 %2205, %v624_v39   ;;  %v640_v48 = vmul.f32 %v624_v39, %v2653_v56  ;;  %v545_v56 = vld [vmem:[%s3105_s4 + $0x68] sm:$0xff]  ;;  %v899_v39 = vld [vmem:[%s3108_s7 + $0x78] sm:$0xff] }
 0x1b6   :  { %803 = vperm.xlu1 %2206, %v653_v15   ;;  %v639_v54 = vmul.f32 %v623_v50, %v2655_v43  ;;  %v887_v43 = vld [vmem:[%s3108_s7 + $0x18] sm:$0xff]  ;;  %v1245_v31 = vld [vmem:[%s3109_s8 + $0x8] sm:$0xff]  ;;  %v868_v15 = vld [vmem:[%s3107_s6] sm:$0xff] }
 0x1b7   :  { %v595_v51 = vadd.f32 1e-05, %v579_v44  ;;  %v656_v52 = vsub.f32 %v560_v45, %v640_v48  ;;  %1987 = vmatmul.mubr.msk.f32.gmra.mrb[2].mxu1 %vm901_vm3, %v887_v43  ;;  %v1247_v44 = vld [vmem:[%s3109_s8 + $0x18] sm:$0xff]  ;;  %v1254_v45 = vld [vmem:[%s3109_s8 + $0x50] sm:$0xff]  ;;  %v1249_v48 = vld [vmem:[%s3109_s8 + $0x28] sm:$0xff] }
 0x1b8   :  { %v655_v63 = vsub.f32 %v559_v19, %v639_v54  ;;  %1989 = vmatprep.mubr.msk.f32.mxu1 %vm901_vm3, %v888_v6  ;;  %v1388_v54 = vld [vmem:[%s3111_s10] sm:$0xff]  ;;  %v1390_v19 = vld [vmem:[%s3111_s10 + $0x10] sm:$0xff]  ;;  %v1389_v43 = vld [vmem:[%s3111_s10 + $0x8] sm:$0xff] }
 0x1b9   :  { %2237 = vrsqrt.f32 %v595_v51  ;;  %818 = vperm.xlu0 %2205, %v656_v52   ;;  %v1251_v51 = vld [vmem:[%s3109_s8 + $0x38] sm:$0xff]  ;;  %v1258_v52 = vld [vmem:[%s3109_s8 + $0x70] sm:$0xff] }
 0x1ba   :  { %v2234_v55 = vpop.eup %2233  ;;  %717 = vperm.xlu1 %2206, %v623_v50   ;;  %v1256_v50 = vld [vmem:[%s3109_s8 + $0x60] sm:$0xff]  ;;  %v1647_v6 = vld [vmem:[%s3112_s11 + $0x10] sm:$0xff] }
 0x1bb   :  { %v2236_v14 = vpop.eup %2235  ;;  %v626_v61 = vmul.f32 %v2234_v55, %v546_v53  ;;  %1990 = vmatmul.mubr.msk.f32.gmra.mrb[4].mxu1 %vm901_vm3, %v889_v7  ;;  %v1253_v53 = vld [vmem:[%s3109_s8 + $0x48] sm:$0xff]  ;;  %v1255_v55 = vld [vmem:[%s3109_s8 + $0x58] sm:$0xff]  ;;  %v1396_v7 = vld [vmem:[%s3111_s10 + $0x40] sm:$0xff] }
 0x1bc   :  { %v625_v3 = vmul.f32 %v2236_v14, %v545_v56  ;;  %v1257_v56 = vld [vmem:[%s3109_s8 + $0x68] sm:$0xff]  ;;  %v1392_v14 = vld [vmem:[%s3111_s10 + $0x20] sm:$0xff] }
 0x1bd   :  { %732 = vperm.xlu0 %2205, %v626_v61   ;;  %v642_v0 = vmul.f32 %v626_v61, %v2686_v37  ;;  %v1259_v61 = vld [vmem:[%s3109_s8 + $0x78] sm:$0xff] }
 0x1be   :  { %813 = vperm.xlu1 %2206, %v655_v63   ;;  %v641_v10 = vmul.f32 %v625_v3, %v2688_v38  ;;  %v890_v38 = vld [vmem:[%s3108_s7 + $0x30] sm:$0xff]  ;;  %v1391_v63 = vld [vmem:[%s3111_s10 + $0x18] sm:$0xff] }
 0x1bf   :  { %v658_v5 = vsub.f32 %v562_v62, %v642_v0  ;;  %1992 = vmatprep.mubr.msk.f32.mxu1 %vm901_vm3, %v890_v38  ;;  %v1393_v62 = vld [vmem:[%s3111_s10 + $0x28] sm:$0xff]  ;;  %v1394_v0 = vld [vmem:[%s3111_s10 + $0x30] sm:$0xff] }
 0x1c0   :  { %v657_v17 = vsub.f32 %v561_v12, %v641_v10  ;;  %1993 = vmatmul.mubr.msk.f32.gmra.mrb[6].mxu1 %vm901_vm3, %v891_v36  ;;  %v1648_v10 = vld [vmem:[%s3112_s11 + $0x18] sm:$0xff]  ;;  %v1398_v12 = vld [vmem:[%s3111_s10 + $0x50] sm:$0xff]  ;;  %v1650_v38 = vld [vmem:[%s3112_s11 + $0x28] sm:$0xff] }
 0x1c1   :  { %828 = vperm.xlu0 %2205, %v658_v5   ;;  %1995 = vmatprep.mubr.msk.f32.mxu1 %vm901_vm3, %v892_v24  ;;  %v1395_v5 = vld [vmem:[%s3111_s10 + $0x38] sm:$0xff]  ;;  %v1400_v24 = vld [vmem:[%s3111_s10 + $0x60] sm:$0xff] }
 0x1c2   :  { %727 = vperm.xlu1 %2206, %v625_v3   ;;  %v1645_v3 = vld [vmem:[%s3112_s11] sm:$0xff]  ;;  %v1399_v36 = vld [vmem:[%s3111_s10 + $0x58] sm:$0xff] }
 0x1c3   :  { %v2238_v37 = vpop.eup %2237 }
 0x1c4   :  { %v627_v20 = vmul.f32 %v2238_v37, %v547_v1  ;;  %1996 = vmatmul.mubr.msk.f32.gmra.mrb[8].mxu1 %vm901_vm3, %v893_v25  ;;  %v1397_v37 = vld [vmem:[%s3111_s10 + $0x48] sm:$0xff] }
 0x1c5   :  { %1262 = vperm.xlu0 %2205, %v1244_v11   ;;  %1998 = vmatprep.mubr.msk.f32.mxu1 %vm901_vm3, %v894_v29  ;;  %v1649_v11 = vld [vmem:[%s3112_s11 + $0x20] sm:$0xff] }
 0x1c6   :  { %823 = vperm.xlu1 %2206, %v657_v17   ;;  %v643_v26 = vmul.f32 %v627_v20, %v2708_v16 }
 0x1c8   :  { %v659_v16 = vsub.f32 %v563_v28, %v643_v26  ;;  %1999 = vmatmul.mubr.msk.f32.gmra.mrb[10].mxu1 %vm901_vm3, %v895_v30  ;;  %v1652_v26 = vld [vmem:[%s3112_s11 + $0x38] sm:$0xff]  ;;  %v1401_v28 = vld [vmem:[%s3111_s10 + $0x68] sm:$0xff]  ;;  %v1653_v30 = vld [vmem:[%s3112_s11 + $0x40] sm:$0xff] }
 0x1c9   :  { %1272 = vperm.xlu0 %2205, %v1246_v21   ;;  %2001 = vmatprep.mubr.msk.f32.mxu1 %vm901_vm3, %v896_v13 }
 0x1ca   :  { %737 = vperm.xlu1 %2206, %v627_v20   ;;  %v1651_v20 = vld [vmem:[%s3112_s11 + $0x30] sm:$0xff] }
 0x1cc   :  { %2002 = vmatmul.mubr.msk.f32.gmra.mrb[12].mxu1 %vm901_vm3, %v897_v41  ;;  %v1654_v41 = vld [vmem:[%s3112_s11 + $0x48] sm:$0xff] }
 0x1cd   :  { %1282 = vperm.xlu0 %2205, %v1248_v27   ;;  %2004 = vmatprep.mubr.msk.f32.mxu1 %vm901_vm3, %v898_v18 }
 0x1ce   :  { %833 = vperm.xlu1 %2206, %v659_v16  }
 0x1d0   :  { %2005 = vmatmul.mubr.msk.f32.gmra.mrb[14].mxu1 %vm901_vm3, %v899_v39 }
 0x1d1   :  { %1292 = vperm.xlu0 %2205, %v1250_v2   ;;  %2039 = vmatprep.mubr.f32.mxu1 %v868_v15  ;;  %v1402_v2 = vld [vmem:[%s3111_s10 + $0x70] sm:$0xff] }
 0x1d2   :  { %1267 = vperm.xlu1 %2206, %v1245_v31  }
 0x1d5   :  { %1302 = vperm.xlu0 %2205, %v1252_v32  }
 0x1d6   :  { %1277 = vperm.xlu1 %2206, %v1247_v44   ;;  %v1403_v44 = vld [vmem:[%s3111_s10 + $0x78] sm:$0xff] }
 0x1d9   :  { %1312 = vperm.xlu0 %2205, %v1254_v45  }
 0x1da   :  { %1287 = vperm.xlu1 %2206, %v1249_v48   ;;  %v1655_v48 = vld [vmem:[%s3112_s11 + $0x50] sm:$0xff] }
 0x1dd   :  { %1322 = vperm.xlu0 %2205, %v1256_v50  }
 0x1de   :  { %1297 = vperm.xlu1 %2206, %v1251_v51  }
 0x1e1   :  { %1332 = vperm.xlu0 %2205, %v1258_v52  }
 0x1e2   :  { %1307 = vperm.xlu1 %2206, %v1253_v53  }
 0x1e5   :  { %1406 = vperm.xlu0 %2205, %v1388_v54   ;;  %v1659_v54 = vld [vmem:[%s3112_s11 + $0x70] sm:$0xff] }
 0x1e6   :  { %1317 = vperm.xlu1 %2206, %v1255_v55  }
 0x1e9   :  { %1416 = vperm.xlu0 %2205, %v1390_v19  }
 0x1ea   :  { %1327 = vperm.xlu1 %2206, %v1257_v56   ;;  %v1656_v56 = vld [vmem:[%s3112_s11 + $0x58] sm:$0xff] }
 0x1ed   :  { %1426 = vperm.xlu0 %2205, %v1392_v14  }
 0x1ee   :  { %1337 = vperm.xlu1 %2206, %v1259_v61  }
 0x1f1   :  { %1668 = vperm.xlu0 %2205, %v1646_v33   ;;  %v1794_v33 = vld [vmem:[#allocation2] sm:$0x1] }
 0x1f2   :  { %1411 = vperm.xlu1 %2206, %v1389_v43  }
 0x1f5   :  { %1431 = vperm.xlu0 %2205, %v1393_v62  }
 0x1f6   :  { %1421 = vperm.xlu1 %2206, %v1391_v63  }
 0x1f9   :  { %1436 = vperm.xlu0 %2205, %v1394_v0   ;;  %v1657_v0 = vld [vmem:[%s3112_s11 + $0x60] sm:$0xff] }
 0x1fa   :  { %1663 = vperm.xlu1 %2206, %v1645_v3  }
 0x1fd   :  { %1441 = vperm.xlu0 %2205, %v1395_v5  }
 0x1fe   :  { %1673 = vperm.xlu1 %2206, %v1647_v6  }
 0x201   :  { %1446 = vperm.xlu0 %2205, %v1396_v7  }
 0x202   :  { %1678 = vperm.xlu1 %2206, %v1648_v10  }
 0x205   :  { %1451 = vperm.xlu0 %2205, %v1397_v37  }
 0x206   :  { %1683 = vperm.xlu1 %2206, %v1649_v11  }
 0x208   :  { %v668_v1 = vpop.permute.xlu0 %667 }
 0x209   :  { %1456 = vperm.xlu0 %2205, %v1398_v12   ;;  %v741_v13 = vmul.f32 %v668_v1, %v2456_v40 }
 0x20a   :  { %1688 = vperm.xlu1 %2206, %v1650_v38  }
 0x20c   :  { %v673_v17 = vpop.permute.xlu0 %672 }
 0x20d   :  { %1461 = vperm.xlu0 %2205, %v1399_v36   ;;  %v663_v21 = vpop.permute.xlu1 %662  ;;  %v742_v45 = vmul.f32 %v673_v17, %v2466_v49 }
 0x20e   :  { %1693 = vperm.xlu1 %2206, %v1651_v20   ;;  %v740_v32 = vmul.f32 %v663_v21, %v2458_v42 }
 0x210   :  { %v769_v25 = vpop.permute.xlu0 %768 }
 0x211   :  { %1466 = vperm.xlu0 %2205, %v1400_v24   ;;  %v764_v27 = vpop.permute.xlu1 %763  ;;  %v838_v51 = vadd.f32 %v769_v25, %v742_v45 }
 0x212   :  { %1698 = vperm.xlu1 %2206, %v1652_v26   ;;  %v837_v18 = vadd.f32 %v764_v27, %v741_v13 }
 0x213   :  { %v854_v14 = vmax.f32 %v838_v51, 0.0 }
 0x214   :  { %v683_v29 = vpop.permute.xlu0 %682  ;;  %v853_v50 = vmax.f32 %v837_v18, 0.0 }
 0x215   :  { %1471 = vperm.xlu0 %2205, %v1401_v28   ;;  %v678_v16 = vpop.permute.xlu1 %677  ;;  %v744_v43 = vmul.f32 %v683_v29, %v2478_v60  ;;  %v1658_v60 = vld [vmem:[%s3112_s11 + $0x68] sm:$0xff] }
 0x216   :  { %1703 = vperm.xlu1 %2206, %v1653_v30   ;;  %v743_v42 = vmul.f32 %v678_v16, %v2476_v59 }
 0x218   :  { %v779_v31 = vpop.permute.xlu0 %778 }
 0x219   :  { %1476 = vperm.xlu0 %2205, %v1402_v2   ;;  %v759_v39 = vpop.permute.xlu1 %758  ;;  %v840_v3 = vadd.f32 %v779_v31, %v744_v43 }
 0x21a   :  { %v836_v15 = vadd.f32 %v759_v39, %v740_v32  ;;  %1708 = vperm.xlu1 %2206, %v1654_v41  }
 0x21b   :  { %v856_v37 = vmax.f32 %v840_v3, 0.0  ;;  %v872_v3 = vld [vmem:[%s3107_s6 + $0x20] sm:$0xff] }
 0x21c   :  { %v693_v40 = vpop.permute.xlu0 %692  ;;  %v852_v52 = vmax.f32 %v836_v15, 0.0 }
 0x21d   :  { %1481 = vperm.xlu0 %2205, %v1403_v44   ;;  %v774_v53 = vpop.permute.xlu1 %773  ;;  %v746_v1 = vmul.f32 %v693_v40, %v2491_v9 }
 0x21e   :  { %v2123_v55 = vpack.c.bf16 %v853_v50, %v852_v52  ;;  %v839_v49 = vadd.f32 %v774_v53, %v743_v42  ;;  %1713 = vperm.xlu1 %2206, %v1655_v48  }
 0x220   :  { %v789_v19 = vpop.permute.xlu0 %788  ;;  %v855_v61 = vmax.f32 %v839_v49, 0.0  ;;  %2124 = vmatprep.subr.bf16.mxu1 %v2123_v55 }
 0x221   :  { %1733 = vperm.xlu0 %2205, %v1659_v54   ;;  %v688_v59 = vpop.permute.xlu1 %687  ;;  %2126 = vmatpush3.bf16.msra.mxu1 %v2123_v55  ;;  %v842_v17 = vadd.f32 %v789_v19, %v746_v1  ;;  %v881_v1 = vld [vmem:[%s3107_s6 + $0x68] sm:$0xff] }
 0x222   :  { %v2127_v62 = vpack.c.bf16 %v855_v61, %v854_v14  ;;  %1718 = vperm.xlu1 %2206, %v1656_v56   ;;  %v745_v5 = vmul.f32 %v688_v59, %v2489_v8  ;;  %v1660_v8 = vld [vmem:[%s3112_s11 + $0x78] sm:$0xff] }
 0x223   :  { %v858_v25 = vmax.f32 %v842_v17, 0.0 }
 0x224   :  { %v703_v63 = vpop.permute.xlu0 %702  ;;  %2128 = vmatprep.subr.bf16.mxu1 %v2127_v62 }
 0x225   :  { %1797 = vperm.xlu0 %2205, %v1794_v33   ;;  %v784_v6 = vpop.permute.xlu1 %783  ;;  %2130 = vmatpush3.bf16.msra.mxu1 %v2127_v62  ;;  %v748_v9 = vmul.f32 %v703_v63, %v2505_v23 }
 0x226   :  { %v841_v7 = vadd.f32 %v784_v6, %v745_v5  ;;  %1723 = vperm.xlu1 %2206, %v1657_v0   ;;  %v869_v0 = vld [vmem:[%s3107_s6 + $0x8] sm:$0xff]  ;;  %v874_v6 = vld [vmem:[%s3107_s6 + $0x30] sm:$0xff] }
 0x227   :  { %v873_v5 = vld [vmem:[%s3107_s6 + $0x28] sm:$0xff] }
 0x228   :  { %v799_v10 = vpop.permute.xlu0 %798  ;;  %v857_v11 = vmax.f32 %v841_v7, 0.0  ;;  %v875_v7 = vld [vmem:[%s3107_s6 + $0x38] sm:$0xff] }
 0x229   :  { %v698_v12 = vpop.permute.xlu1 %697  ;;  %v844_v30 = vadd.f32 %v799_v10, %v748_v9  ;;  %v876_v10 = vld [vmem:[%s3107_s6 + $0x40] sm:$0xff] }
 0x22a   :  { %v2131_v38 = vpack.c.bf16 %v857_v11, %v856_v37  ;;  %1728 = vperm.xlu1 %2206, %v1658_v60   ;;  %v747_v20 = vmul.f32 %v698_v12, %v2503_v22  ;;  %v877_v60 = vld [vmem:[%s3107_s6 + $0x48] sm:$0xff]  ;;  %v878_v37 = vld [vmem:[%s3107_s6 + $0x50] sm:$0xff]  ;;  %v879_v11 = vld [vmem:[%s3107_s6 + $0x58] sm:$0xff] }
 0x22b   :  { %v860_v31 = vmax.f32 %v844_v30, 0.0  ;;  %v880_v12 = vld [vmem:[%s3107_s6 + $0x60] sm:$0xff] }
 0x22c   :  { %v713_v36 = vpop.permute.xlu0 %712  ;;  %2132 = vmatprep.subr.bf16.mxu1 %v2131_v38 }
 0x22d   :  { %v794_v21 = vpop.permute.xlu1 %793  ;;  %2134 = vmatpush3.bf16.msra.mxu1 %v2131_v38  ;;  %v750_v18 = vmul.f32 %v713_v36, %v2519_v35  ;;  %v882_v38 = vld [vmem:[%s3107_s6 + $0x70] sm:$0xff]  ;;  %v883_v36 = vld [vmem:[%s3107_s6 + $0x78] sm:$0xff] }
 0x22e   :  { %v843_v24 = vadd.f32 %v794_v21, %v747_v20  ;;  %1738 = vperm.xlu1 %2206, %v1660_v8   ;;  %v1372_v8 = vld [vmem:[%s3110_s9] sm:$0xff] }
 0x22f   :  { %2095 = vmatprep.mubr.f32.mxu0 %v1372_v8 }
 0x230   :  { %v859_v26 = vmax.f32 %v843_v24, 0.0  ;;  %v809_v28 = vpop.permute.xlu0 %808 }
 0x231   :  { %v708_v27 = vpop.permute.xlu1 %707  ;;  %v846_v44 = vadd.f32 %v809_v28, %v750_v18 }
 0x232   :  { %v2135_v29 = vpack.c.bf16 %v859_v26, %v858_v25  ;;  %v749_v16 = vmul.f32 %v708_v27, %v2517_v34 }
 0x233   :  { %v862_v34 = vmax.f32 %v846_v44, 0.0 }
 0x234   :  { %2136 = vmatprep.subr.bf16.mxu1 %v2135_v29  ;;  %v723_v22 = vpop.permute.xlu0 %722 }
 0x235   :  { %v804_v2 = vpop.permute.xlu1 %803  ;;  %2138 = vmatpush3.bf16.msra.mxu1 %v2135_v29  ;;  %v752_v51 = vmul.f32 %v723_v22, %v2533_v47 }
 0x236   :  { %v845_v13 = vadd.f32 %v804_v2, %v749_v16 }
 0x238   :  { %v861_v41 = vmax.f32 %v845_v13, 0.0  ;;  %v819_v23 = vpop.permute.xlu0 %818 }
 0x239   :  { %v718_v32 = vpop.permute.xlu1 %717  ;;  %v848_v53 = vadd.f32 %v819_v23, %v752_v51 }
 0x23a   :  { %v2139_v39 = vpack.c.bf16 %v861_v41, %v860_v31  ;;  %v751_v45 = vmul.f32 %v718_v32, %v2531_v46 }
 0x23b   :  { %v864_v46 = vmax.f32 %v848_v53, 0.0 }
 0x23c   :  { %2140 = vmatprep.subr.bf16.mxu1 %v2139_v39  ;;  %v733_v52 = vpop.permute.xlu0 %732 }
 0x23d   :  { %v814_v15 = vpop.permute.xlu1 %813  ;;  %2142 = vmatpush3.bf16.msra.mxu1 %v2139_v39  ;;  %v754_v14 = vmul.f32 %v733_v52, %v2547_v58  ;;  %v870_v58 = vld [vmem:[%s3107_s6 + $0x10] sm:$0xff] }
 0x23e   :  { %v847_v40 = vadd.f32 %v814_v15, %v751_v45 }
 0x240   :  { %v863_v48 = vmax.f32 %v847_v40, 0.0  ;;  %v829_v19 = vpop.permute.xlu0 %828 }
 0x241   :  { %v728_v50 = vpop.permute.xlu1 %727  ;;  %v850_v59 = vadd.f32 %v829_v19, %v754_v14 }
 0x242   :  { %v2143_v42 = vpack.c.bf16 %v863_v48, %v862_v34  ;;  %v753_v54 = vmul.f32 %v728_v50, %v2545_v57 }
 0x243   :  { %v866_v62 = vmax.f32 %v850_v59, 0.0 }
 0x244   :  { %2144 = vmatprep.subr.bf16.mxu1 %v2143_v42  ;;  %v1263_v20 = vpop.permute.xlu0 %1262 }
 0x245   :  { %v824_v35 = vpop.permute.xlu1 %823  ;;  %2146 = vmatpush3.bf16.msra.mxu1 %v2143_v42 }
 0x246   :  { %v849_v55 = vadd.f32 %v824_v35, %v753_v54 }
 0x248   :  { %v865_v49 = vmax.f32 %v849_v55, 0.0  ;;  %v1273_v24 = vpop.permute.xlu0 %1272 }
 0x249   :  { %v738_v56 = vpop.permute.xlu1 %737 }
 0x24a   :  { %v2147_v61 = vpack.c.bf16 %v865_v49, %v864_v46  ;;  %v755_v33 = vmul.f32 %v738_v56, %v2559_v4  ;;  %v871_v4 = vld [vmem:[%s3107_s6 + $0x18] sm:$0xff] }
 0x24c   :  { %2148 = vmatprep.subr.bf16.mxu1 %v2147_v61  ;;  %v1283_v26 = vpop.permute.xlu0 %1282 }
 0x24d   :  { %v834_v47 = vpop.permute.xlu1 %833  ;;  %2150 = vmatpush3.bf16.msra.mxu1 %v2147_v61 }
 0x24e   :  { %v851_v43 = vadd.f32 %v834_v47, %v755_v33 }
 0x250   :  { %v867_v57 = vmax.f32 %v851_v43, 0.0  ;;  %v1293_v22 = vpop.permute.xlu0 %1292 }
 0x251   :  { %v1268_v17 = vpop.permute.xlu1 %1267 }
 0x252   :  { %v2151_v63 = vpack.c.bf16 %v867_v57, %v866_v62 }
 0x254   :  { %2152 = vmatprep.subr.bf16.mxu1 %v2151_v63  ;;  %v1303_v50 = vpop.permute.xlu0 %1302 }
 0x255   :  { %2154 = vmatpush3.bf16.msra.mxu1 %v2151_v63  ;;  %v1278_v21 = vpop.permute.xlu1 %1277 }
 0x258   :  { %2040 = vmatmul.mubr.f32.vlgmr.msra.gmra.mrb[0].mxu1 %v869_v0  ;;  %v1313_v14 = vpop.permute.xlu0 %1312 }
 0x259   :  { %2042 = vmatprep.mubr.f32.mxu1 %v870_v58  ;;  %v1288_v25 = vpop.permute.xlu1 %1287 }
 0x25c   :  { %2043 = vmatmul.mubr.f32.gmra.mrb[2].mxu1 %v871_v4 }
 0x25d   :  { %2045 = vmatprep.mubr.f32.mxu1 %v872_v3  ;;  %v1298_v16 = vpop.permute.xlu1 %1297 }
 0x260   :  { %2046 = vmatmul.mubr.f32.gmra.mrb[4].mxu1 %v873_v5  ;;  %v1323_v5 = vpop.permute.xlu0 %1322 }
 0x261   :  { %2048 = vmatprep.mubr.f32.mxu1 %v874_v6  ;;  %v1308_v40 = vpop.permute.xlu1 %1307 }
 0x264   :  { %2049 = vmatmul.mubr.f32.gmra.mrb[6].mxu1 %v875_v7 }
 0x265   :  { %2051 = vmatprep.mubr.f32.mxu1 %v876_v10  ;;  %v1318_v49 = vpop.permute.xlu1 %1317 }
 0x268   :  { %2052 = vmatmul.mubr.f32.gmra.mrb[8].mxu1 %v877_v60 }
 0x269   :  { %2054 = vmatprep.mubr.f32.mxu1 %v878_v37  ;;  %v1328_v58 = vpop.permute.xlu1 %1327 }
 0x26c   :  { %2055 = vmatmul.mubr.f32.gmra.mrb[10].mxu1 %v879_v11 }
 0x26d   :  { %2057 = vmatprep.mubr.f32.mxu1 %v880_v12 }
 0x270   :  { %2058 = vmatmul.mubr.f32.gmra.mrb[12].mxu1 %v881_v1 }
 0x271   :  { %2060 = vmatprep.mubr.f32.mxu1 %v882_v38  ;;  %v1338_v38 = vpop.permute.xlu1 %1337 }
 0x274   :  { %2061 = vmatmul.mubr.f32.gmra.mrb[14].mxu1 %v883_v36 }
 0x32b   :  { %v2041_v27 = vpop.f32.mrb[0].mxu1 }
 0x32c   :  { %v1341_v28 = vadd.f32 %v2041_v27, %v1268_v17  ;;  %v1165_v9 = vpop.f32.mrb[1].mxu1  ;;  %v1333_v17 = vpop.permute.xlu0 %1332 }
 0x32d   :  { %v1340_v29 = vadd.f32 %v1263_v20, %v1165_v9  ;;  %v1373_v9 = vld [vmem:[%s3110_s9 + $0x8] sm:$0xff] }
 0x32e   :  { %v1357_v30 = vmax.f32 %v1341_v28, 0.0 }
 0x32f   :  { %v1356_v2 = vmax.f32 %v1340_v29, 0.0  ;;  %v2044_v13 = vpop.f32.mrb[2].mxu1  ;;  %v1374_v29 = vld [vmem:[%s3110_s9 + $0x10] sm:$0xff] }
 0x330   :  { %v1343_v31 = vadd.f32 %v2044_v13, %v1278_v21  ;;  %v1175_v41 = vpop.f32.mrb[3].mxu1  ;;  %v1378_v13 = vld [vmem:[%s3110_s9 + $0x30] sm:$0xff] }
 0x331   :  { %v2155_v32 = vpack.c.bf16 %v1357_v30, %v1356_v2  ;;  %v1342_v18 = vadd.f32 %v1273_v24, %v1175_v41  ;;  %v1375_v30 = vld [vmem:[%s3110_s9 + $0x18] sm:$0xff]  ;;  %v1377_v2 = vld [vmem:[%s3110_s9 + $0x28] sm:$0xff] }
 0x332   :  { %v1359_v39 = vmax.f32 %v1343_v31, 0.0  ;;  %v1380_v31 = vld [vmem:[%s3110_s9 + $0x40] sm:$0xff]  ;;  %v1381_v41 = vld [vmem:[%s3110_s9 + $0x48] sm:$0xff] }
 0x333   :  { %v1358_v44 = vmax.f32 %v1342_v18, 0.0  ;;  %v2047_v45 = vpop.f32.mrb[4].mxu1  ;;  %2156 = vmatprep.subr.bf16.mxu0 %v2155_v32  ;;  %v1383_v18 = vld [vmem:[%s3110_s9 + $0x58] sm:$0xff] }
 0x334   :  { %v1345_v23 = vadd.f32 %v2047_v45, %v1288_v25  ;;  %v1185_v15 = vpop.f32.mrb[5].mxu1  ;;  %2158 = vmatpush3.bf16.msra.mxu0 %v2155_v32  ;;  %v1382_v32 = vld [vmem:[%s3110_s9 + $0x50] sm:$0xff] }
 0x335   :  { %v2159_v34 = vpack.c.bf16 %v1359_v39, %v1358_v44  ;;  %v1344_v48 = vadd.f32 %v1283_v26, %v1185_v15  ;;  %v1384_v39 = vld [vmem:[%s3110_s9 + $0x60] sm:$0xff]  ;;  %v1385_v44 = vld [vmem:[%s3110_s9 + $0x68] sm:$0xff]  ;;  %v1386_v45 = vld [vmem:[%s3110_s9 + $0x70] sm:$0xff]  ;;  %v1407_v15 = vpop.permute.xlu0 %1406 }
 0x336   :  { %v1361_v51 = vmax.f32 %v1345_v23, 0.0  ;;  %v1387_v23 = vld [vmem:[%s3110_s9 + $0x78] sm:$0xff] }
 0x337   :  { %v1360_v42 = vmax.f32 %v1344_v48, 0.0  ;;  %v2050_v52 = vpop.f32.mrb[6].mxu1  ;;  %2160 = vmatprep.subr.bf16.mxu0 %v2159_v34 }
 0x338   :  { %v1347_v53 = vadd.f32 %v2050_v52, %v1298_v16  ;;  %v1195_v54 = vpop.f32.mrb[7].mxu1  ;;  %2162 = vmatpush3.bf16.msra.mxu0 %v2159_v34  ;;  %v1376_v16 = vld [vmem:[%s3110_s9 + $0x20] sm:$0xff] }
 0x339   :  { %v2163_v35 = vpack.c.bf16 %v1361_v51, %v1360_v42  ;;  %v1346_v55 = vadd.f32 %v1293_v22, %v1195_v54  ;;  %v1379_v22 = vld [vmem:[%s3110_s9 + $0x38] sm:$0xff]  ;;  %v1417_v34 = vpop.permute.xlu0 %1416  ;;  %s2264_s9 = smov [#allocation3]  }
 0x33a   :  { %v1363_v46 = vmax.f32 %v1347_v53, 0.0  ;;  %s1813_s8 = sshll.u32 %s2264_s9, 4  ;;  %s1814_s8 = int_to_ptr.vmem [resolvable:$true] %s1813_s8 }
 0x33b   :  { %v1362_v19 = vmax.f32 %v1346_v55, 0.0  ;;  %v2053_v56 = vpop.f32.mrb[8].mxu1  ;;  %2164 = vmatprep.subr.bf16.mxu0 %v2163_v35  ;;  %s2239_s25 = scalar_lea.vmem %s1814_s8, 16  ;;  %s2243_s1 = scalar_lea.vmem %s1814_s8, 32 }
 0x33c   :  { %v1349_v61 = vadd.f32 %v2053_v56, %v1308_v40  ;;  %v1205_v59 = vpop.f32.mrb[9].mxu1  ;;  %2166 = vmatpush3.bf16.msra.mxu0 %v2163_v35  ;;  %v1412_v40 = vpop.permute.xlu1 %1411  ;;  %p2240_p0 = scmp.ne.s32.totalorder %s1814_s8, %s2239_s25  ;;  %p2244_p1 = scmp.lt.s32.totalorder %s1814_s8, %s1814_s8 }
 0x33d   :  { %v2167_v33 = vpack.c.bf16 %v1363_v46, %v1362_v19  ;;  %v1348_v47 = vadd.f32 %v1303_v50, %v1205_v59  ;;  %v1427_v50 = vpop.permute.xlu0 %1426  ;;  %p2245_p2 = scmp.lt.s32.totalorder %s2243_s1, %s2239_s25 }
 0x33e   :  { %v1365_v43 = vmax.f32 %v1349_v61, 0.0 }
 0x33f   :  { %v1364_v62 = vmax.f32 %v1348_v47, 0.0  ;;  %v2056_v57 = vpop.f32.mrb[10].mxu1  ;;  %2168 = vmatprep.subr.bf16.mxu0 %v2167_v33  ;;  %p2246_p3 = por %p2245_p2, %p2244_p1 }
 0x340   :  { %v1351_v63 = vadd.f32 %v2056_v57, %v1318_v49  ;;  %v1215_v0 = vpop.f32.mrb[11].mxu1  ;;  %2170 = vmatpush3.bf16.msra.mxu0 %v2167_v33  ;;  %v1422_v48 = vpop.permute.xlu1 %1421 }
 0x341   :  { %v2171_v4 = vpack.c.bf16 %v1365_v43, %v1364_v62  ;;  %v1350_v3 = vadd.f32 %v1313_v14, %v1215_v0  ;;  %v1669_v42 = vpop.permute.xlu0 %1668  ;;  %p2247_p4 = pnand %p2246_p3, %p2240_p0 }
 0x342   :  { %v1367_v6 = vmax.f32 %v1351_v63, 0.0 }
 0x343   :  { %v1366_v7 = vmax.f32 %v1350_v3, 0.0  ;;  %v2059_v10 = vpop.f32.mrb[12].mxu1  ;;  %2172 = vmatprep.subr.bf16.mxu0 %v2171_v4 }
 0x344   :  { %v1353_v60 = vadd.f32 %v2059_v10, %v1328_v58  ;;  %v1225_v37 = vpop.f32.mrb[13].mxu1  ;;  %2174 = vmatpush3.bf16.msra.mxu0 %v2171_v4  ;;  %v1664_v51 = vpop.permute.xlu1 %1663 }
 0x345   :  { %v2175_v11 = vpack.c.bf16 %v1367_v6, %v1366_v7  ;;  %v1352_v12 = vadd.f32 %v1323_v5, %v1225_v37  ;;  %v1432_v53 = vpop.permute.xlu0 %1431 }
 0x346   :  { %v1369_v1 = vmax.f32 %v1353_v60, 0.0 }
 0x347   :  { %v1368_v36 = vmax.f32 %v1352_v12, 0.0  ;;  %v2062_v8 = vpop.f32.mrb[14].mxu1  ;;  %2176 = vmatprep.subr.bf16.mxu0 %v2175_v11 }
 0x348   :  { %v1355_v20 = vadd.f32 %v2062_v8, %v1338_v38  ;;  %v1235_v21 = vpop.f32.mrb[15].mxu1  ;;  %2178 = vmatpush3.bf16.msra.mxu0 %v2175_v11  ;;  %v1674_v52 = vpop.permute.xlu1 %1673 }
 0x349   :  { %v2179_v24 = vpack.c.bf16 %v1369_v1, %v1368_v36  ;;  %v1354_v25 = vadd.f32 %v1333_v17, %v1235_v21  ;;  %v1437_v35 = vpop.permute.xlu0 %1436 }
 0x34a   :  { %v1371_v26 = vmax.f32 %v1355_v20, 0.0 }
 0x34b   :  { %v1370_v27 = vmax.f32 %v1354_v25, 0.0  ;;  %2180 = vmatprep.subr.bf16.mxu0 %v2179_v24 }
 0x34c   :  { %2182 = vmatpush3.bf16.msra.mxu0 %v2179_v24  ;;  %v1679_v54 = vpop.permute.xlu1 %1678 }
 0x34d   :  { %v2183_v28 = vpack.c.bf16 %v1371_v26, %v1370_v27  ;;  %v1442_v46 = vpop.permute.xlu0 %1441 }
 0x34f   :  { %2184 = vmatprep.subr.bf16.mxu0 %v2183_v28 }
 0x350   :  { %2186 = vmatpush3.bf16.msra.mxu0 %v2183_v28  ;;  %v1684_v55 = vpop.permute.xlu1 %1683 }
 0x351   :  { %v1447_v19 = vpop.permute.xlu0 %1446 }
 0x353   :  { %2096 = vmatmul.mubr.f32.vlgmr.msra.gmra.mrb[16].mxu0 %v1373_v9 }
 0x354   :  { %2098 = vmatprep.mubr.f32.mxu0 %v1374_v29  ;;  %v1689_v49 = vpop.permute.xlu1 %1688 }
 0x355   :  { %v1452_v14 = vpop.permute.xlu0 %1451 }
 0x357   :  { %2099 = vmatmul.mubr.f32.gmra.mrb[18].mxu0 %v1375_v30 }
 0x358   :  { %2101 = vmatprep.mubr.f32.mxu0 %v1376_v16  ;;  %v1694_v56 = vpop.permute.xlu1 %1693 }
 0x359   :  { %v3067_v59 = vpop.permute.xlu0 %1456 }
 0x35b   :  { %2102 = vmatmul.mubr.f32.gmra.mrb[20].mxu0 %v1377_v2 }
 0x35c   :  { %2104 = vmatprep.mubr.f32.mxu0 %v1378_v13  ;;  %v1699_v61 = vpop.permute.xlu1 %1698 }
 0x35d   :  { %v1462_v57 = vpop.permute.xlu0 %1461 }
 0x35f   :  { %2105 = vmatmul.mubr.f32.gmra.mrb[22].mxu0 %v1379_v22 }
 0x360   :  { %2107 = vmatprep.mubr.f32.mxu0 %v1380_v31  ;;  %v3069_v33 = vpop.permute.xlu1 %1703 }
 0x361   :  { %v1467_v12 = vpop.permute.xlu0 %1466 }
 0x363   :  { %2108 = vmatmul.mubr.f32.gmra.mrb[24].mxu0 %v1381_v41 }
 0x364   :  { %2110 = vmatprep.mubr.f32.mxu0 %v1382_v32  ;;  %v1709_v0 = vpop.permute.xlu1 %1708 }
 0x365   :  { %v1472_v13 = vpop.permute.xlu0 %1471 }
 0x367   :  { %2111 = vmatmul.mubr.f32.gmra.mrb[26].mxu0 %v1383_v18 }
 0x368   :  { %2113 = vmatprep.mubr.f32.mxu0 %v1384_v39  ;;  %v1714_v8 = vpop.permute.xlu1 %1713 }
 0x36b   :  { %2114 = vmatmul.mubr.f32.gmra.mrb[28].mxu0 %v1385_v44 }
 0x36c   :  { %2116 = vmatprep.mubr.f32.mxu0 %v1386_v45  ;;  %v1719_v18 = vpop.permute.xlu1 %1718 }
 0x36f   :  { %2117 = vmatmul.mubr.f32.gmra.mrb[30].mxu0 %v1387_v23 }
 0x426   :  { %v2097_v47 = vpop.f32.mrb[16].mxu0 }
 0x427   :  { %v1556_v43 = vadd.f32 %v2097_v47, %v1412_v40  ;;  %v1550_v62 = vpop.f32.mrb[17].mxu0  ;;  %v1724_v47 = vpop.permute.xlu1 %1723 }
 0x428   :  { %v1551_v63 = vadd.f32 %v1550_v62, %v1407_v15 }
 0x429   :  { %v1630_v58 = vmax.f32 %v1556_v43, 0.0 }
 0x42a   :  { %v1629_v4 = vmax.f32 %v1551_v63, 0.0  ;;  %v2100_v3 = vpop.f32.mrb[18].mxu0 }
 0x42b   :  { %v1742_v5 = vmul.f32 %v1669_v42, %v1630_v58  ;;  %v1566_v6 = vadd.f32 %v2100_v3, %v1422_v48  ;;  %v1560_v7 = vpop.f32.mrb[19].mxu0 }
 0x42c   :  { %v1741_v10 = vmul.f32 %v1664_v51, %v1629_v4  ;;  %v1561_v60 = vadd.f32 %v1560_v7, %v1417_v34 }
 0x42d   :  { %v1758_v37 = vsel %vm355_vm1, %v1742_v5, 0.0  ;;  %v1632_v11 = vmax.f32 %v1566_v6, 0.0 }
 0x42e   :  { %v1757_v1 = vsel %vm355_vm1, %v1741_v10, 0.0  ;;  %v1631_v38 = vmax.f32 %v1561_v60, 0.0  ;;  %v2103_v36 = vpop.f32.mrb[20].mxu0 }
 0x42f   :  { %v1759_v17 = vadd.f32 %v1758_v37, %v1757_v1  ;;  %v1576_v20 = vadd.f32 %v2103_v36, %v1432_v53  ;;  %v1570_v21 = vpop.f32.mrb[21].mxu0  ;;  %v1744_v24 = vmul.f32 %v1679_v54, %v1632_v11 }
 0x430   :  { %v1743_v25 = vmul.f32 %v1674_v52, %v1631_v38  ;;  %v1571_v26 = vadd.f32 %v1570_v21, %v1427_v50 }
 0x431   :  { %v1634_v27 = vmax.f32 %v1576_v20, 0.0  ;;  %v1762_v22 = vsel %vm355_vm1, %v1744_v24, 0.0 }
 0x432   :  { %v1760_v28 = vsel %vm355_vm1, %v1743_v25, 0.0  ;;  %v1633_v9 = vmax.f32 %v1571_v26, 0.0  ;;  %v2106_v29 = vpop.f32.mrb[22].mxu0 }
 0x433   :  { %v1761_v30 = vadd.f32 %v1760_v28, %v1759_v17  ;;  %v1586_v16 = vadd.f32 %v2106_v29, %v1442_v46  ;;  %v1580_v2 = vpop.f32.mrb[23].mxu0  ;;  %v1746_v31 = vmul.f32 %v1689_v49, %v1634_v27  ;;  %v1477_v46 = vpop.permute.xlu0 %1476 }
 0x434   :  { %v1745_v41 = vmul.f32 %v1684_v55, %v1633_v9  ;;  %v1581_v32 = vadd.f32 %v1580_v2, %v1437_v35 }
 0x435   :  { %v1763_v39 = vadd.f32 %v1762_v22, %v1761_v30  ;;  %v1636_v44 = vmax.f32 %v1586_v16, 0.0  ;;  %v1766_v50 = vsel %vm355_vm1, %v1746_v31, 0.0 }
 0x436   :  { %v1764_v45 = vsel %vm355_vm1, %v1745_v41, 0.0  ;;  %v1635_v23 = vmax.f32 %v1581_v32, 0.0  ;;  %v2109_v15 = vpop.f32.mrb[24].mxu0 }
 0x437   :  { %v1765_v40 = vadd.f32 %v1764_v45, %v1763_v39  ;;  %v1596_v34 = vadd.f32 %v2109_v15, %v1452_v14  ;;  %v1590_v48 = vpop.f32.mrb[25].mxu0  ;;  %v1748_v51 = vmul.f32 %v1699_v61, %v1636_v44  ;;  %v1482_v38 = vpop.permute.xlu0 %1481  ;;  %v1800_v45 = vlaneseq }
 0x438   :  { %v1747_v42 = vmul.f32 %v1694_v56, %v1635_v23  ;;  %v1591_v52 = vadd.f32 %v1590_v48, %v1447_v19 }
 0x439   :  { %v1767_v53 = vadd.f32 %v1766_v50, %v1765_v40  ;;  %v1638_v54 = vmax.f32 %v1596_v34, 0.0  ;;  %v1770_v58 = vsel %vm355_vm1, %v1748_v51, 0.0  ;;  %v1801_v40 = vshrl.u32 %v1800_v45, 7 }
 0x43a   :  { %v1768_v35 = vsel %vm355_vm1, %v1747_v42, 0.0  ;;  %v1637_v55 = vmax.f32 %v1591_v52, 0.0  ;;  %v2112_v49 = vpop.f32.mrb[26].mxu0 }
 0x43b   :  { %v1769_v43 = vadd.f32 %v1768_v35, %v1767_v53  ;;  %v1606_v62 = vadd.f32 %v2112_v49, %v1462_v57  ;;  %v1600_v63 = vpop.f32.mrb[27].mxu0  ;;  %v1750_v14 = vmul.f32 %v1709_v0, %v1638_v54  ;;  %v1729_v0 = vpop.permute.xlu1 %1728  ;;  %v1802_v50 = vsub.s32 0, %v1801_v40 }
 0x43c   :  { %v1749_v4 = vmul.f32 %v3069_v33, %v1637_v55  ;;  %v1601_v61 = vadd.f32 %v1600_v63, %v3067_v59  ;;  %v1734_v16 = vpop.permute.xlu0 %1733 }
 0x43d   :  { %v1771_v56 = vadd.f32 %v1770_v58, %v1769_v43  ;;  %v1640_v19 = vmax.f32 %v1606_v62, 0.0  ;;  %v1774_v37 = vsel %vm355_vm1, %v1750_v14, 0.0 }
 0x43e   :  { %v1772_v3 = vsel %vm355_vm1, %v1749_v4, 0.0  ;;  %v1639_v5 = vmax.f32 %v1601_v61, 0.0  ;;  %v2115_v6 = vpop.f32.mrb[28].mxu0 }
 0x43f   :  { %v1773_v7 = vadd.f32 %v1772_v3, %v1771_v56  ;;  %v1616_v10 = vadd.f32 %v2115_v6, %v1472_v13  ;;  %v1610_v60 = vpop.f32.mrb[29].mxu0  ;;  %v1752_v57 = vmul.f32 %v1719_v18, %v1640_v19  ;;  %v1739_v2 = vpop.permute.xlu1 %1738 }
 0x440   :  { %v1751_v11 = vmul.f32 %v1714_v8, %v1639_v5  ;;  %v1611_v1 = vadd.f32 %v1610_v60, %v1467_v12  ;;  %v1798_v42 = vpop.permute.xlu0 %1797 }
 0x441   :  { %v1775_v36 = vadd.f32 %v1774_v37, %v1773_v7  ;;  %v1642_v33 = vmax.f32 %v1616_v10, 0.0  ;;  %v1778_v26 = vsel %vm355_vm1, %v1752_v57, 0.0  ;;  %v1803_v53 = vrot.slane %v1798_v42, %v1802_v50 }
 0x442   :  { %v1776_v59 = vsel %vm355_vm1, %v1751_v11, 0.0  ;;  %v1641_v17 = vmax.f32 %v1611_v1, 0.0  ;;  %v2118_v20 = vpop.f32.mrb[30].mxu0 }
 0x443   :  { %v1777_v21 = vadd.f32 %v1776_v59, %v1775_v36  ;;  %v1626_v24 = vadd.f32 %v2118_v20, %v1482_v38  ;;  %v1620_v25 = vpop.f32.mrb[31].mxu0  ;;  %v1754_v27 = vmul.f32 %v1729_v0, %v1642_v33 }
 0x444   :  { %v1753_v28 = vmul.f32 %v1724_v47, %v1641_v17  ;;  %v1621_v9 = vadd.f32 %v1620_v25, %v1477_v46 }
 0x445   :  { %v1779_v29 = vadd.f32 %v1778_v26, %v1777_v21  ;;  %v1644_v30 = vmax.f32 %v1626_v24, 0.0  ;;  %v1782_v22 = vsel %vm355_vm1, %v1754_v27, 0.0 }
 0x446   :  { %v1780_v12 = vsel %vm355_vm1, %v1753_v28, 0.0  ;;  %v1643_v8 = vmax.f32 %v1621_v9, 0.0 }
 0x447   :  { %v1781_v13 = vadd.f32 %v1780_v12, %v1779_v29  ;;  %v1756_v31 = vmul.f32 %v1739_v2, %v1644_v30 }
 0x448   :  { %v1755_v41 = vmul.f32 %v1734_v16, %v1643_v8 }
 0x449   :  { %v1783_v32 = vadd.f32 %v1782_v22, %v1781_v13  ;;  %v1786_v44 = vsel %vm355_vm1, %v1756_v31, 0.0 }
 0x44a   :  { %v1784_v18 = vsel %vm355_vm1, %v1755_v41, 0.0 }
 0x44b   :  { %v1785_v39 = vadd.f32 %v1784_v18, %v1783_v32 }
 0x44d   :  { %v1787_v23 = vadd.f32 %v1786_v44, %v1785_v39 }
 0x44f   :  { %v1788_v15 = vrot.slane %v1787_v23, 4 }
 0x451   :  { %v1789_v34 = vadd.f32 %v1788_v15, %v1787_v23 }
 0x453   :  { %v1790_v48 = vrot.slane %v1789_v34, 2 }
 0x455   :  { %v1791_v51 = vadd.f32 %v1790_v48, %v1789_v34 }
 0x457   :  { %v1792_v52 = vrot.slane %v1791_v51, 1 }
 0x459   :  { %v1793_v54 = vadd.f32 %v1792_v52, %v1791_v51 }
 0x45b   :  { %v1804_v46 = vadd.f32 %v1803_v53, %v1793_v54 }
 0x45d   :  { %1806 = vst.msk [vmem:[#allocation3] sm:$0x1] %vm1805_vm4, %v1804_v46 }
 0x45e   :  { %2250 = shalt.err (!%p2247_p4)
}
 0x45f   :  { %s2251_s27 = scalar_lea.hbm %s3114_s13, 16 }
 0x460   :  { %p2252_p5 = scmp.ne.s32.totalorder %s3114_s13, %s2251_s27  ;;  %p2255_p6 = scmp.lt.u32.totalorder %s2251_s27, %s3114_s13 }
 0x462   :  { %p2257_p7 = pnand %p2255_p6, %p2252_p5 }
 0x464   :  { %2260 = shalt.err (!%p2257_p7)
}
 0x465   :  { %1816 = dma.vmem_to_hbm [thread:$0]  %s1814_s8, 16, %s3114_s13, [#allocation4]  }
 0x466   :  { %2261 = dma.done.wait [#allocation4], 16  }
 0x467   :  { %2262 = vsyncadd [#allocation4], 4294967280 }
 0x468   :  { %1820 = vsyncpa [#allocation4], 1 }

</bundles_post_ra>
